<compile_context>
chip_gen: v7x
topology: tpu7x:2x2x1
jax: 0.10.0
libtpu: 0.0.40
codegen_flags: <defaults>
</compile_context>

<pallas_src>
import functools

import jax
import jax.numpy as jnp
import numpy as np
from jax import lax
from jax.experimental import pallas as pl
from jax.experimental.pallas import tpu as pltpu


def ffn_layer_kernel(x_tile_ref, x_full_ref,
                     wqkv_ref, bqkv_ref, wo_ref, bo_ref,
                     w1_ref, b1_ref, w2_ref, b2_ref,
                     g1_ref, be1_ref, g2_ref, be2_ref,
                     o_ref,
                     q_s, k_s, v_s, ctx_s,
                     *, nhead, eps, tq):
    D = x_tile_ref.shape[-1]
    hd = D // nhead
    scale = 1.0 / float(np.sqrt(hd))
    qi = pl.program_id(1)

    # ---- fused QKV projection for the full sequence, once per batch element ----
    @pl.when(qi == 0)
    def _():
        xf = x_full_ref[0].astype(jnp.bfloat16)                      # (S, D)
        qkv = jnp.dot(xf, wqkv_ref[...],
                      preferred_element_type=jnp.float32)            # (S, 3D) fp32
        qkv = qkv + bqkv_ref[...]
        q_s[...] = qkv[:, :D]                                        # fp32 scratch
        k_s[...] = qkv[:, D:2 * D].astype(k_s.dtype)                 # bf16 scratch
        v_s[...] = qkv[:, 2 * D:].astype(v_s.dtype)                  # bf16 scratch

    # ---- attention for this query tile ----
    q_start = pl.multiple_of(qi * tq, tq)
    q_tile = q_s[pl.ds(q_start, tq), :].astype(jnp.bfloat16)         # (TQ, D)

    # TODO(synk): hd < 128 underfills the MXU; for real configs pack heads.
    for h in range(nhead):                                           # static unroll
        sl = slice(h * hd, (h + 1) * hd)
        s = jnp.einsum('qd,kd->qk', q_tile[:, sl], k_s[:, sl],
                       preferred_element_type=jnp.float32) * scale   # (TQ, S) fp32
        m = jnp.max(s, axis=-1, keepdims=True)
        p = jnp.exp(s - m)
        denom = jnp.sum(p, axis=-1, keepdims=True)
        p = p * pl.reciprocal(denom, approx=True)                    # EUP, not VPU div
        ctx_s[:, sl] = jnp.einsum('qk,kd->qd', p.astype(jnp.bfloat16),
                                  v_s[:, sl],
                                  preferred_element_type=jnp.float32)

    # ---- output projection + residual + LayerNorm1 (post-norm) ----
    x_t = x_tile_ref[0].astype(jnp.float32)                          # (TQ, D)
    attn = jnp.dot(ctx_s[...].astype(jnp.bfloat16), wo_ref[...],
                   preferred_element_type=jnp.float32) + bo_ref[...]
    h1 = x_t + attn
    mu1 = jnp.mean(h1, axis=-1, keepdims=True)
    var1 = jnp.mean((h1 - mu1) ** 2, axis=-1, keepdims=True)
    h1 = (h1 - mu1) * lax.rsqrt(var1 + eps) * g1_ref[...] + be1_ref[...]

    # ---- feed-forward: linear2(relu(linear1(h1))) ----
    f = jnp.dot(h1.astype(jnp.bfloat16), w1_ref[...],
                preferred_element_type=jnp.float32) + b1_ref[...]
    f = jnp.maximum(f, 0.0)
    y = jnp.dot(f.astype(jnp.bfloat16), w2_ref[...],
                preferred_element_type=jnp.float32) + b2_ref[...]

    # ---- residual + LayerNorm2 ----
    h2 = h1 + y
    mu2 = jnp.mean(h2, axis=-1, keepdims=True)
    var2 = jnp.mean((h2 - mu2) ** 2, axis=-1, keepdims=True)
    out = (h2 - mu2) * lax.rsqrt(var2 + eps) * g2_ref[...] + be2_ref[...]

    o_ref[0] = out.astype(o_ref.dtype)


def ffn_forward(x, params, *, nhead=8, eps=1e-5, tq=None):
    B, S, D = x.shape
    F_ = params['w1'].shape[1]
    assert D % nhead == 0
    if tq is None:
        tq = min(S, 128)
    assert S % tq == 0 and tq % 8 == 0
    nq = S // tq

    mxu = jnp.bfloat16
    # Host-side prep: fused QKV weight, bf16 weights, fp32 biases / LN params.
    w_qkv = jnp.concatenate([params['wq'], params['wk'], params['wv']], axis=1).astype(mxu)
    b_qkv = jnp.concatenate([params['bq'], params['bk'], params['bv']], axis=1).astype(jnp.float32)
    wo = params['wo'].astype(mxu)
    w1 = params['w1'].astype(mxu)
    w2 = params['w2'].astype(mxu)
    bo = params['bo'].astype(jnp.float32)
    b1 = params['b1'].astype(jnp.float32)
    b2 = params['b2'].astype(jnp.float32)
    g1 = params['g1'].astype(jnp.float32)
    be1 = params['be1'].astype(jnp.float32)
    g2 = params['g2'].astype(jnp.float32)
    be2 = params['be2'].astype(jnp.float32)

    kern = functools.partial(ffn_layer_kernel, nhead=nhead, eps=eps, tq=tq)

    def const(shape):
        # Weights / biases: block index never changes -> fetched once (revisit).
        return pl.BlockSpec(shape, lambda b, q: (0, 0))

    in_specs = [
        pl.BlockSpec((1, tq, D), lambda b, q: (b, q, 0)),   # x, query tile
        pl.BlockSpec((1, S, D), lambda b, q: (b, 0, 0)),    # x, full seq (K/V source)
        const((D, 3 * D)), const((1, 3 * D)),               # fused QKV weight / bias
        const((D, D)), const((1, D)),                       # out proj
        const((D, F_)), const((1, F_)),                     # linear1
        const((F_, D)), const((1, D)),                      # linear2
        const((1, D)), const((1, D)),                       # LayerNorm1 gamma / beta
        const((1, D)), const((1, D)),                       # LayerNorm2 gamma / beta
    ]
    out_spec = pl.BlockSpec((1, tq, D), lambda b, q: (b, q, 0))

    scratch_shapes = [
        pltpu.VMEM((S, D), jnp.float32),   # Q (full sequence, fp32 for dyn slicing)
        pltpu.VMEM((S, D), mxu),           # K (bf16, MXU input)
        pltpu.VMEM((S, D), mxu),           # V (bf16, MXU input)
        pltpu.VMEM((tq, D), jnp.float32),  # per-tile attention context
    ]

    # Explicit scoped-VMEM budget sized from the real footprint (with headroom),
    # clamped so it stays legal on every chip generation.
    weight_bytes = sum(int(np.prod(a.shape)) * a.dtype.itemsize
                       for a in (w_qkv, wo, w1, w2))
    act_bytes = 4 * (4 * S * D + tq * S + tq * F_ + 6 * tq * D)
    vmem_limit = int(min(max(4 * weight_bytes + 2 * act_bytes + (8 << 20),
                             32 << 20), 64 << 20))

    return pl.pallas_call(
        kern,
        out_shape=jax.ShapeDtypeStruct((B, S, D), x.dtype),
        grid_spec=pltpu.PrefetchScalarGridSpec(
            num_scalar_prefetch=0,
            grid=(B, nq),
            in_specs=in_specs,
            out_specs=out_spec,
            scratch_shapes=scratch_shapes,
        ),
        compiler_params=pltpu.CompilerParams(
            dimension_semantics=("parallel", "arbitrary"),
            vmem_limit_bytes=vmem_limit,
        ),
    )(x, x, w_qkv, b_qkv, wo, bo, w1, b1, w2, b2, g1, be1, g2, be2)


def ffn_reference(x, params, *, nhead=8, eps=1e-5, matmul_dtype=jnp.float32):
    """Pure-JAX reference of the PyTorch forward (eval mode, dropouts = id).

    matmul_dtype=bfloat16 mimics the kernel's mixed-precision scheme (bf16 MXU
    inputs, fp32 accumulation, fp32 softmax/LayerNorm statistics).
    """
    B, S, D = x.shape
    hd = D // nhead
    scale = 1.0 / float(np.sqrt(hd))
    md = matmul_dtype

    def mm(a, w):
        return jnp.dot(a.astype(md), w.astype(md),
                       preferred_element_type=jnp.float32)

    q = mm(x, params['wq']) + params['bq']
    k = mm(x, params['wk']) + params['bk']
    v = mm(x, params['wv']) + params['bv']
    qh = q.reshape(B, S, nhead, hd).transpose(0, 2, 1, 3)
    kh = k.reshape(B, S, nhead, hd).transpose(0, 2, 1, 3)
    vh = v.reshape(B, S, nhead, hd).transpose(0, 2, 1, 3)
    s = jnp.einsum('bhqd,bhkd->bhqk', qh.astype(md), kh.astype(md),
                   preferred_element_type=jnp.float32) * scale
    p = jax.nn.softmax(s, axis=-1)
    ctx = jnp.einsum('bhqk,bhkd->bhqd', p.astype(md), vh.astype(md),
                     preferred_element_type=jnp.float32)
    ctx = ctx.transpose(0, 2, 1, 3).reshape(B, S, D)
    attn = mm(ctx, params['wo']) + params['bo']

    def ln(h, g, b):
        mu = h.mean(-1, keepdims=True)
        var = ((h - mu) ** 2).mean(-1, keepdims=True)
        return (h - mu) / jnp.sqrt(var + eps) * g + b

    h1 = ln(x + attn, params['g1'], params['be1'])
    f = jnp.maximum(mm(h1, params['w1']) + params['b1'], 0.0)
    f = mm(f, params['w2']) + params['b2']
    return ln(h1 + f, params['g2'], params['be2'])


def make_params(key, d_model, dim_ff):
    ks = jax.random.split(key, 12)
    s = 0.1
    return {
        'wq': s * jax.random.normal(ks[0], (d_model, d_model), jnp.float32),
        'wk': s * jax.random.normal(ks[1], (d_model, d_model), jnp.float32),
        'wv': s * jax.random.normal(ks[2], (d_model, d_model), jnp.float32),
        'bq': s * jax.random.normal(ks[3], (1, d_model), jnp.float32),
        'bk': s * jax.random.normal(ks[4], (1, d_model), jnp.float32),
        'bv': s * jax.random.normal(ks[5], (1, d_model), jnp.float32),
        'wo': s * jax.random.normal(ks[6], (d_model, d_model), jnp.float32),
        'bo': s * jax.random.normal(ks[7], (1, d_model), jnp.float32),
        'w1': s * jax.random.normal(ks[8], (d_model, dim_ff), jnp.float32),
        'b1': s * jax.random.normal(ks[9], (1, dim_ff), jnp.float32),
        'w2': s * jax.random.normal(ks[10], (dim_ff, d_model), jnp.float32),
        'b2': s * jax.random.normal(ks[11], (1, d_model), jnp.float32),
        'g1': jnp.ones((1, d_model), jnp.float32),
        'be1': jnp.zeros((1, d_model), jnp.float32),
        'g2': jnp.ones((1, d_model), jnp.float32),
        'be2': jnp.zeros((1, d_model), jnp.float32),
    }


if __name__ == "__main__":
    B, S = 2, 16
    d_model, dim_ff, nhead = 32, 64, 8
    tq = 8   # 2 query tiles per batch element -> exercises K/V scratch reuse

    key = jax.random.PRNGKey(0)
    kx, kp = jax.random.split(key)
    x = jax.random.normal(kx, (B, S, d_model), jnp.float32)
    params = make_params(kp, d_model, dim_ff)

    out = jax.block_until_ready(ffn_forward(x, params, nhead=nhead, tq=tq))

    ref_bf16 = jax.block_until_ready(
        ffn_reference(x, params, nhead=nhead, matmul_dtype=jnp.bfloat16))
    ref_f32 = jax.block_until_ready(
        ffn_reference(x, params, nhead=nhead, matmul_dtype=jnp.float32))

    assert out.shape == (B, S, d_model)
    # Implementation correctness vs. a reference using the same precision scheme.
    np.testing.assert_allclose(np.asarray(out), np.asarray(ref_bf16),
                               rtol=5e-3, atol=5e-3)
    # Numerics vs. the pure fp32 PyTorch-equivalent forward (bf16 MXU inputs).
    np.testing.assert_allclose(np.asarray(out), np.asarray(ref_f32),
                               rtol=3e-2, atol=3e-2)
    print("KERNEL_OK")
</pallas_src>

<mosaic_0001>
module attributes {stable_mosaic.version = 11 : i64} {
  func.func @ffn_layer_kernel(%arg0: i32, %arg1: i32, %arg2: memref<1x8x32xf32, #tpu.memory_space<vmem>>, %arg3: memref<1x16x32xf32, #tpu.memory_space<vmem>>, %arg4: memref<32x96xbf16, #tpu.memory_space<vmem>>, %arg5: memref<1x96xf32, #tpu.memory_space<vmem>>, %arg6: memref<32x32xbf16, #tpu.memory_space<vmem>>, %arg7: memref<1x32xf32, #tpu.memory_space<vmem>>, %arg8: memref<32x64xbf16, #tpu.memory_space<vmem>>, %arg9: memref<1x64xf32, #tpu.memory_space<vmem>>, %arg10: memref<64x32xbf16, #tpu.memory_space<vmem>>, %arg11: memref<1x32xf32, #tpu.memory_space<vmem>>, %arg12: memref<1x32xf32, #tpu.memory_space<vmem>>, %arg13: memref<1x32xf32, #tpu.memory_space<vmem>>, %arg14: memref<1x32xf32, #tpu.memory_space<vmem>>, %arg15: memref<1x32xf32, #tpu.memory_space<vmem>>, %arg16: memref<1x8x32xf32, #tpu.memory_space<vmem>>, %arg17: memref<16x32xf32, #tpu.memory_space<vmem>>, %arg18: memref<16x32xbf16, #tpu.memory_space<vmem>>, %arg19: memref<16x32xbf16, #tpu.memory_space<vmem>>, %arg20: memref<8x32xf32, #tpu.memory_space<vmem>>) attributes {dimension_semantics = [#tpu.dimension_semantics<parallel>, #tpu.dimension_semantics<arbitrary>], iteration_bounds = array<i64: 2, 2>, scalar_prefetch = 0 : i64, scratch_operands = 4 : i64, tpu.core_type = #tpu.core_type<tc>, window_params = [{transform_indices = @transform_0, window_bounds = array<i64: 1, 8, 32>}, {transform_indices = @transform_1, window_bounds = array<i64: 1, 16, 32>}, {pipeline_mode = #tpu.pipeline_mode<synchronous>, transform_indices = @transform_2, window_bounds = array<i64: 32, 96>}, {pipeline_mode = #tpu.pipeline_mode<synchronous>, transform_indices = @transform_3, window_bounds = array<i64: 1, 96>}, {pipeline_mode = #tpu.pipeline_mode<synchronous>, transform_indices = @transform_4, window_bounds = array<i64: 32, 32>}, {pipeline_mode = #tpu.pipeline_mode<synchronous>, transform_indices = @transform_5, window_bounds = array<i64: 1, 32>}, {pipeline_mode = #tpu.pipeline_mode<synchronous>, transform_indices = @transform_6, window_bounds = array<i64: 32, 64>}, {pipeline_mode = #tpu.pipeline_mode<synchronous>, transform_indices = @transform_7, window_bounds = array<i64: 1, 64>}, {pipeline_mode = #tpu.pipeline_mode<synchronous>, transform_indices = @transform_8, window_bounds = array<i64: 64, 32>}, {pipeline_mode = #tpu.pipeline_mode<synchronous>, transform_indices = @transform_9, window_bounds = array<i64: 1, 32>}, {pipeline_mode = #tpu.pipeline_mode<synchronous>, transform_indices = @transform_10, window_bounds = array<i64: 1, 32>}, {pipeline_mode = #tpu.pipeline_mode<synchronous>, transform_indices = @transform_11, window_bounds = array<i64: 1, 32>}, {pipeline_mode = #tpu.pipeline_mode<synchronous>, transform_indices = @transform_12, window_bounds = array<i64: 1, 32>}, {pipeline_mode = #tpu.pipeline_mode<synchronous>, transform_indices = @transform_13, window_bounds = array<i64: 1, 32>}, {transform_indices = @transform_14, window_bounds = array<i64: 1, 8, 32>}]} {
    %c0_i32 = arith.constant 0 : i32
    %0 = arith.cmpi eq, %arg1, %c0_i32 : i32
    %1 = arith.extui %0 : i1 to i32
    %c0_i32_0 = arith.constant 0 : i32
    %2 = arith.cmpi ne, %1, %c0_i32_0 : i32
    scf.if %2 {
      %c0_123 = arith.constant 0 : index
      %c0_124 = arith.constant 0 : index
      %c0_125 = arith.constant 0 : index
      %236 = vector.load %arg3[%c0_123, %c0_124, %c0_125] : memref<1x16x32xf32, #tpu.memory_space<vmem>>, vector<1x16x32xf32>
      %237 = vector.shape_cast %236 : vector<1x16x32xf32> to vector<16x32xf32>
      %238 = arith.truncf %237 : vector<16x32xf32> to vector<16x32xbf16>
      %c0_126 = arith.constant 0 : index
      %c0_127 = arith.constant 0 : index
      %239 = vector.load %arg4[%c0_126, %c0_127] : memref<32x96xbf16, #tpu.memory_space<vmem>>, vector<32x96xbf16>
      %cst_128 = arith.constant dense<0.000000e+00> : vector<16x96xf32>
      %240 = tpu.matmul %238, %239, %cst_128 {dimension_numbers = #tpu.dot_dimension_numbers<[1], [0], [0], [1], [0, 0, 1, 1], [], []>} : vector<16x32xbf16>, vector<32x96xbf16>, vector<16x96xf32> -> vector<16x96xf32>
      %c0_129 = arith.constant 0 : index
      %c0_130 = arith.constant 0 : index
      %241 = vector.load %arg5[%c0_129, %c0_130] : memref<1x96xf32, #tpu.memory_space<vmem>>, vector<1x96xf32>
      %242 = vector.broadcast %241 : vector<1x96xf32> to vector<16x96xf32>
      %243 = arith.addf %240, %242 : vector<16x96xf32>
      %244 = vector.extract_strided_slice %243 {offsets = [0, 0], sizes = [16, 32], strides = [1, 1]} : vector<16x96xf32> to vector<16x32xf32>
      %c0_131 = arith.constant 0 : index
      %c0_132 = arith.constant 0 : index
      %245 = vector.load %arg17[%c0_131, %c0_132] : memref<16x32xf32, #tpu.memory_space<vmem>>, vector<16x32xf32>
      tpu.vector_store %arg17[%c0_131, %c0_132], %244 {strides = array<i32>} : memref<16x32xf32, #tpu.memory_space<vmem>>, vector<16x32xf32>,
      %246 = vector.extract_strided_slice %243 {offsets = [0, 32], sizes = [16, 32], strides = [1, 1]} : vector<16x96xf32> to vector<16x32xf32>
      %247 = arith.truncf %246 : vector<16x32xf32> to vector<16x32xbf16>
      %c0_133 = arith.constant 0 : index
      %c0_134 = arith.constant 0 : index
      %248 = vector.load %arg18[%c0_133, %c0_134] : memref<16x32xbf16, #tpu.memory_space<vmem>>, vector<16x32xbf16>
      tpu.vector_store %arg18[%c0_133, %c0_134], %247 {strides = array<i32>} : memref<16x32xbf16, #tpu.memory_space<vmem>>, vector<16x32xbf16>,
      %249 = vector.extract_strided_slice %243 {offsets = [0, 64], sizes = [16, 32], strides = [1, 1]} : vector<16x96xf32> to vector<16x32xf32>
      %250 = arith.truncf %249 : vector<16x32xf32> to vector<16x32xbf16>
      %c0_135 = arith.constant 0 : index
      %c0_136 = arith.constant 0 : index
      %251 = vector.load %arg19[%c0_135, %c0_136] : memref<16x32xbf16, #tpu.memory_space<vmem>>, vector<16x32xbf16>
      tpu.vector_store %arg19[%c0_135, %c0_136], %250 {strides = array<i32>} : memref<16x32xbf16, #tpu.memory_space<vmem>>, vector<16x32xbf16>,
    } else {
    }
    %c8_i32 = arith.constant 8 : i32
    %3 = arith.muli %arg1, %c8_i32 : i32
    %4 = tpu.assume_multiple %3, 8 : i32
    %5 = arith.index_cast %4 : i32 to index
    %c0 = arith.constant 0 : index
    %6 = vector.load %arg17[%5, %c0] : memref<16x32xf32, #tpu.memory_space<vmem>>, vector<8x32xf32>
    %7 = arith.truncf %6 : vector<8x32xf32> to vector<8x32xbf16>
    %8 = vector.extract_strided_slice %7 {offsets = [0, 0], sizes = [8, 4], strides = [1, 1]} : vector<8x32xbf16> to vector<8x4xbf16>
    %c0_1 = arith.constant 0 : index
    %c0_2 = arith.constant 0 : index
    %9 = vector.load %arg18[%c0_1, %c0_2] : memref<16x32xbf16, #tpu.memory_space<vmem>>, vector<16x4xbf16>
    "tpu.trace_start"() <{level = 10 : i32, message = "qd,kd->qk"}> : () -> ()
    %cst = arith.constant dense<0.000000e+00> : vector<8x16xf32>
    %10 = tpu.matmul %8, %9, %cst {dimension_numbers = #tpu.dot_dimension_numbers<[1], [1], [0], [0], [0, 0, 1, 0], [], []>} : vector<8x4xbf16>, vector<16x4xbf16>, vector<8x16xf32> -> vector<8x16xf32>
    "tpu.trace_stop"() : () -> ()
    %cst_3 = arith.constant 5.000000e-01 : f32
    %11 = vector.broadcast %cst_3 : f32 to vector<8x16xf32>
    %12 = arith.mulf %10, %11 : vector<8x16xf32>
    %cst_4 = arith.constant dense<0xFF800000> : vector<8xf32>
    %13 = vector.multi_reduction <maximumf>, %12, %cst_4 [1] : vector<8x16xf32> to vector<8xf32>
    %14 = vector.shape_cast %13 : vector<8xf32> to vector<8x1xf32>
    %15 = vector.broadcast %14 : vector<8x1xf32> to vector<8x16xf32>
    %16 = arith.subf %12, %15 : vector<8x16xf32>
    %17 = math.exp %16 : vector<8x16xf32>
    %cst_5 = arith.constant dense<0.000000e+00> : vector<8xf32>
    %18 = vector.multi_reduction <add>, %17, %cst_5 [1] : vector<8x16xf32> to vector<8xf32>
    %19 = vector.shape_cast %18 : vector<8xf32> to vector<8x1xf32>
    %20 = tpu.reciprocal %19 {approx = true} : vector<8x1xf32> -> vector<8x1xf32>
    %21 = vector.broadcast %20 : vector<8x1xf32> to vector<8x16xf32>
    %22 = arith.mulf %17, %21 : vector<8x16xf32>
    %23 = arith.truncf %22 : vector<8x16xf32> to vector<8x16xbf16>
    %c0_6 = arith.constant 0 : index
    %c0_7 = arith.constant 0 : index
    %24 = vector.load %arg19[%c0_6, %c0_7] : memref<16x32xbf16, #tpu.memory_space<vmem>>, vector<16x4xbf16>
    "tpu.trace_start"() <{level = 10 : i32, message = "qk,kd->qd"}> : () -> ()
    %cst_8 = arith.constant dense<0.000000e+00> : vector<8x4xf32>
    %25 = tpu.matmul %23, %24, %cst_8 {dimension_numbers = #tpu.dot_dimension_numbers<[1], [0], [0], [1], [0, 0, 1, 1], [], []>} : vector<8x16xbf16>, vector<16x4xbf16>, vector<8x4xf32> -> vector<8x4xf32>
    "tpu.trace_stop"() : () -> ()
    %c0_9 = arith.constant 0 : index
    %c0_10 = arith.constant 0 : index
    %26 = vector.load %arg20[%c0_9, %c0_10] : memref<8x32xf32, #tpu.memory_space<vmem>>, vector<8x4xf32>
    tpu.vector_store %arg20[%c0_9, %c0_10], %25 {strides = array<i32>} : memref<8x32xf32, #tpu.memory_space<vmem>>, vector<8x4xf32>,
    %27 = vector.extract_strided_slice %7 {offsets = [0, 4], sizes = [8, 4], strides = [1, 1]} : vector<8x32xbf16> to vector<8x4xbf16>
    %c0_11 = arith.constant 0 : index
    %c4 = arith.constant 4 : index
    %28 = vector.load %arg18[%c0_11, %c4] : memref<16x32xbf16, #tpu.memory_space<vmem>>, vector<16x4xbf16>
    "tpu.trace_start"() <{level = 10 : i32, message = "qd,kd->qk"}> : () -> ()
    %cst_12 = arith.constant dense<0.000000e+00> : vector<8x16xf32>
    %29 = tpu.matmul %27, %28, %cst_12 {dimension_numbers = #tpu.dot_dimension_numbers<[1], [1], [0], [0], [0, 0, 1, 0], [], []>} : vector<8x4xbf16>, vector<16x4xbf16>, vector<8x16xf32> -> vector<8x16xf32>
    "tpu.trace_stop"() : () -> ()
    %cst_13 = arith.constant 5.000000e-01 : f32
    %30 = vector.broadcast %cst_13 : f32 to vector<8x16xf32>
    %31 = arith.mulf %29, %30 : vector<8x16xf32>
    %cst_14 = arith.constant dense<0xFF800000> : vector<8xf32>
    %32 = vector.multi_reduction <maximumf>, %31, %cst_14 [1] : vector<8x16xf32> to vector<8xf32>
    %33 = vector.shape_cast %32 : vector<8xf32> to vector<8x1xf32>
    %34 = vector.broadcast %33 : vector<8x1xf32> to vector<8x16xf32>
    %35 = arith.subf %31, %34 : vector<8x16xf32>
    %36 = math.exp %35 : vector<8x16xf32>
    %cst_15 = arith.constant dense<0.000000e+00> : vector<8xf32>
    %37 = vector.multi_reduction <add>, %36, %cst_15 [1] : vector<8x16xf32> to vector<8xf32>
    %38 = vector.shape_cast %37 : vector<8xf32> to vector<8x1xf32>
    %39 = tpu.reciprocal %38 {approx = true} : vector<8x1xf32> -> vector<8x1xf32>
    %40 = vector.broadcast %39 : vector<8x1xf32> to vector<8x16xf32>
    %41 = arith.mulf %36, %40 : vector<8x16xf32>
    %42 = arith.truncf %41 : vector<8x16xf32> to vector<8x16xbf16>
    %c0_16 = arith.constant 0 : index
    %c4_17 = arith.constant 4 : index
    %43 = vector.load %arg19[%c0_16, %c4_17] : memref<16x32xbf16, #tpu.memory_space<vmem>>, vector<16x4xbf16>
    "tpu.trace_start"() <{level = 10 : i32, message = "qk,kd->qd"}> : () -> ()
    %cst_18 = arith.constant dense<0.000000e+00> : vector<8x4xf32>
    %44 = tpu.matmul %42, %43, %cst_18 {dimension_numbers = #tpu.dot_dimension_numbers<[1], [0], [0], [1], [0, 0, 1, 1], [], []>} : vector<8x16xbf16>, vector<16x4xbf16>, vector<8x4xf32> -> vector<8x4xf32>
    "tpu.trace_stop"() : () -> ()
    %c0_19 = arith.constant 0 : index
    %c4_20 = arith.constant 4 : index
    %45 = vector.load %arg20[%c0_19, %c4_20] : memref<8x32xf32, #tpu.memory_space<vmem>>, vector<8x4xf32>
    tpu.vector_store %arg20[%c0_19, %c4_20], %44 {strides = array<i32>} : memref<8x32xf32, #tpu.memory_space<vmem>>, vector<8x4xf32>,
    %46 = vector.extract_strided_slice %7 {offsets = [0, 8], sizes = [8, 4], strides = [1, 1]} : vector<8x32xbf16> to vector<8x4xbf16>
    %c0_21 = arith.constant 0 : index
    %c8 = arith.constant 8 : index
    %47 = vector.load %arg18[%c0_21, %c8] : memref<16x32xbf16, #tpu.memory_space<vmem>>, vector<16x4xbf16>
    "tpu.trace_start"() <{level = 10 : i32, message = "qd,kd->qk"}> : () -> ()
    %cst_22 = arith.constant dense<0.000000e+00> : vector<8x16xf32>
    %48 = tpu.matmul %46, %47, %cst_22 {dimension_numbers = #tpu.dot_dimension_numbers<[1], [1], [0], [0], [0, 0, 1, 0], [], []>} : vector<8x4xbf16>, vector<16x4xbf16>, vector<8x16xf32> -> vector<8x16xf32>
    "tpu.trace_stop"() : () -> ()
    %cst_23 = arith.constant 5.000000e-01 : f32
    %49 = vector.broadcast %cst_23 : f32 to vector<8x16xf32>
    %50 = arith.mulf %48, %49 : vector<8x16xf32>
    %cst_24 = arith.constant dense<0xFF800000> : vector<8xf32>
    %51 = vector.multi_reduction <maximumf>, %50, %cst_24 [1] : vector<8x16xf32> to vector<8xf32>
    %52 = vector.shape_cast %51 : vector<8xf32> to vector<8x1xf32>
    %53 = vector.broadcast %52 : vector<8x1xf32> to vector<8x16xf32>
    %54 = arith.subf %50, %53 : vector<8x16xf32>
    %55 = math.exp %54 : vector<8x16xf32>
    %cst_25 = arith.constant dense<0.000000e+00> : vector<8xf32>
    %56 = vector.multi_reduction <add>, %55, %cst_25 [1] : vector<8x16xf32> to vector<8xf32>
    %57 = vector.shape_cast %56 : vector<8xf32> to vector<8x1xf32>
    %58 = tpu.reciprocal %57 {approx = true} : vector<8x1xf32> -> vector<8x1xf32>
    %59 = vector.broadcast %58 : vector<8x1xf32> to vector<8x16xf32>
    %60 = arith.mulf %55, %59 : vector<8x16xf32>
    %61 = arith.truncf %60 : vector<8x16xf32> to vector<8x16xbf16>
    %c0_26 = arith.constant 0 : index
    %c8_27 = arith.constant 8 : index
    %62 = vector.load %arg19[%c0_26, %c8_27] : memref<16x32xbf16, #tpu.memory_space<vmem>>, vector<16x4xbf16>
    "tpu.trace_start"() <{level = 10 : i32, message = "qk,kd->qd"}> : () -> ()
    %cst_28 = arith.constant dense<0.000000e+00> : vector<8x4xf32>
    %63 = tpu.matmul %61, %62, %cst_28 {dimension_numbers = #tpu.dot_dimension_numbers<[1], [0], [0], [1], [0, 0, 1, 1], [], []>} : vector<8x16xbf16>, vector<16x4xbf16>, vector<8x4xf32> -> vector<8x4xf32>
    "tpu.trace_stop"() : () -> ()
    %c0_29 = arith.constant 0 : index
    %c8_30 = arith.constant 8 : index
    %64 = vector.load %arg20[%c0_29, %c8_30] : memref<8x32xf32, #tpu.memory_space<vmem>>, vector<8x4xf32>
    tpu.vector_store %arg20[%c0_29, %c8_30], %63 {strides = array<i32>} : memref<8x32xf32, #tpu.memory_space<vmem>>, vector<8x4xf32>,
    %65 = vector.extract_strided_slice %7 {offsets = [0, 12], sizes = [8, 4], strides = [1, 1]} : vector<8x32xbf16> to vector<8x4xbf16>
    %c0_31 = arith.constant 0 : index
    %c12 = arith.constant 12 : index
    %66 = vector.load %arg18[%c0_31, %c12] : memref<16x32xbf16, #tpu.memory_space<vmem>>, vector<16x4xbf16>
    "tpu.trace_start"() <{level = 10 : i32, message = "qd,kd->qk"}> : () -> ()
    %cst_32 = arith.constant dense<0.000000e+00> : vector<8x16xf32>
    %67 = tpu.matmul %65, %66, %cst_32 {dimension_numbers = #tpu.dot_dimension_numbers<[1], [1], [0], [0], [0, 0, 1, 0], [], []>} : vector<8x4xbf16>, vector<16x4xbf16>, vector<8x16xf32> -> vector<8x16xf32>
    "tpu.trace_stop"() : () -> ()
    %cst_33 = arith.constant 5.000000e-01 : f32
    %68 = vector.broadcast %cst_33 : f32 to vector<8x16xf32>
    %69 = arith.mulf %67, %68 : vector<8x16xf32>
    %cst_34 = arith.constant dense<0xFF800000> : vector<8xf32>
    %70 = vector.multi_reduction <maximumf>, %69, %cst_34 [1] : vector<8x16xf32> to vector<8xf32>
    %71 = vector.shape_cast %70 : vector<8xf32> to vector<8x1xf32>
    %72 = vector.broadcast %71 : vector<8x1xf32> to vector<8x16xf32>
    %73 = arith.subf %69, %72 : vector<8x16xf32>
    %74 = math.exp %73 : vector<8x16xf32>
    %cst_35 = arith.constant dense<0.000000e+00> : vector<8xf32>
    %75 = vector.multi_reduction <add>, %74, %cst_35 [1] : vector<8x16xf32> to vector<8xf32>
    %76 = vector.shape_cast %75 : vector<8xf32> to vector<8x1xf32>
    %77 = tpu.reciprocal %76 {approx = true} : vector<8x1xf32> -> vector<8x1xf32>
    %78 = vector.broadcast %77 : vector<8x1xf32> to vector<8x16xf32>
    %79 = arith.mulf %74, %78 : vector<8x16xf32>
    %80 = arith.truncf %79 : vector<8x16xf32> to vector<8x16xbf16>
    %c0_36 = arith.constant 0 : index
    %c12_37 = arith.constant 12 : index
    %81 = vector.load %arg19[%c0_36, %c12_37] : memref<16x32xbf16, #tpu.memory_space<vmem>>, vector<16x4xbf16>
    "tpu.trace_start"() <{level = 10 : i32, message = "qk,kd->qd"}> : () -> ()
    %cst_38 = arith.constant dense<0.000000e+00> : vector<8x4xf32>
    %82 = tpu.matmul %80, %81, %cst_38 {dimension_numbers = #tpu.dot_dimension_numbers<[1], [0], [0], [1], [0, 0, 1, 1], [], []>} : vector<8x16xbf16>, vector<16x4xbf16>, vector<8x4xf32> -> vector<8x4xf32>
    "tpu.trace_stop"() : () -> ()
    %c0_39 = arith.constant 0 : index
    %c12_40 = arith.constant 12 : index
    %83 = vector.load %arg20[%c0_39, %c12_40] : memref<8x32xf32, #tpu.memory_space<vmem>>, vector<8x4xf32>
    tpu.vector_store %arg20[%c0_39, %c12_40], %82 {strides = array<i32>} : memref<8x32xf32, #tpu.memory_space<vmem>>, vector<8x4xf32>,
    %84 = vector.extract_strided_slice %7 {offsets = [0, 16], sizes = [8, 4], strides = [1, 1]} : vector<8x32xbf16> to vector<8x4xbf16>
    %c0_41 = arith.constant 0 : index
    %c16 = arith.constant 16 : index
    %85 = vector.load %arg18[%c0_41, %c16] : memref<16x32xbf16, #tpu.memory_space<vmem>>, vector<16x4xbf16>
    "tpu.trace_start"() <{level = 10 : i32, message = "qd,kd->qk"}> : () -> ()
    %cst_42 = arith.constant dense<0.000000e+00> : vector<8x16xf32>
    %86 = tpu.matmul %84, %85, %cst_42 {dimension_numbers = #tpu.dot_dimension_numbers<[1], [1], [0], [0], [0, 0, 1, 0], [], []>} : vector<8x4xbf16>, vector<16x4xbf16>, vector<8x16xf32> -> vector<8x16xf32>
    "tpu.trace_stop"() : () -> ()
    %cst_43 = arith.constant 5.000000e-01 : f32
    %87 = vector.broadcast %cst_43 : f32 to vector<8x16xf32>
    %88 = arith.mulf %86, %87 : vector<8x16xf32>
    %cst_44 = arith.constant dense<0xFF800000> : vector<8xf32>
    %89 = vector.multi_reduction <maximumf>, %88, %cst_44 [1] : vector<8x16xf32> to vector<8xf32>
    %90 = vector.shape_cast %89 : vector<8xf32> to vector<8x1xf32>
    %91 = vector.broadcast %90 : vector<8x1xf32> to vector<8x16xf32>
    %92 = arith.subf %88, %91 : vector<8x16xf32>
    %93 = math.exp %92 : vector<8x16xf32>
    %cst_45 = arith.constant dense<0.000000e+00> : vector<8xf32>
    %94 = vector.multi_reduction <add>, %93, %cst_45 [1] : vector<8x16xf32> to vector<8xf32>
    %95 = vector.shape_cast %94 : vector<8xf32> to vector<8x1xf32>
    %96 = tpu.reciprocal %95 {approx = true} : vector<8x1xf32> -> vector<8x1xf32>
    %97 = vector.broadcast %96 : vector<8x1xf32> to vector<8x16xf32>
    %98 = arith.mulf %93, %97 : vector<8x16xf32>
    %99 = arith.truncf %98 : vector<8x16xf32> to vector<8x16xbf16>
    %c0_46 = arith.constant 0 : index
    %c16_47 = arith.constant 16 : index
    %100 = vector.load %arg19[%c0_46, %c16_47] : memref<16x32xbf16, #tpu.memory_space<vmem>>, vector<16x4xbf16>
    "tpu.trace_start"() <{level = 10 : i32, message = "qk,kd->qd"}> : () -> ()
    %cst_48 = arith.constant dense<0.000000e+00> : vector<8x4xf32>
    %101 = tpu.matmul %99, %100, %cst_48 {dimension_numbers = #tpu.dot_dimension_numbers<[1], [0], [0], [1], [0, 0, 1, 1], [], []>} : vector<8x16xbf16>, vector<16x4xbf16>, vector<8x4xf32> -> vector<8x4xf32>
    "tpu.trace_stop"() : () -> ()
    %c0_49 = arith.constant 0 : index
    %c16_50 = arith.constant 16 : index
    %102 = vector.load %arg20[%c0_49, %c16_50] : memref<8x32xf32, #tpu.memory_space<vmem>>, vector<8x4xf32>
    tpu.vector_store %arg20[%c0_49, %c16_50], %101 {strides = array<i32>} : memref<8x32xf32, #tpu.memory_space<vmem>>, vector<8x4xf32>,
    %103 = vector.extract_strided_slice %7 {offsets = [0, 20], sizes = [8, 4], strides = [1, 1]} : vector<8x32xbf16> to vector<8x4xbf16>
    %c0_51 = arith.constant 0 : index
    %c20 = arith.constant 20 : index
    %104 = vector.load %arg18[%c0_51, %c20] : memref<16x32xbf16, #tpu.memory_space<vmem>>, vector<16x4xbf16>
    "tpu.trace_start"() <{level = 10 : i32, message = "qd,kd->qk"}> : () -> ()
    %cst_52 = arith.constant dense<0.000000e+00> : vector<8x16xf32>
    %105 = tpu.matmul %103, %104, %cst_52 {dimension_numbers = #tpu.dot_dimension_numbers<[1], [1], [0], [0], [0, 0, 1, 0], [], []>} : vector<8x4xbf16>, vector<16x4xbf16>, vector<8x16xf32> -> vector<8x16xf32>
    "tpu.trace_stop"() : () -> ()
    %cst_53 = arith.constant 5.000000e-01 : f32
    %106 = vector.broadcast %cst_53 : f32 to vector<8x16xf32>
    %107 = arith.mulf %105, %106 : vector<8x16xf32>
    %cst_54 = arith.constant dense<0xFF800000> : vector<8xf32>
    %108 = vector.multi_reduction <maximumf>, %107, %cst_54 [1] : vector<8x16xf32> to vector<8xf32>
    %109 = vector.shape_cast %108 : vector<8xf32> to vector<8x1xf32>
    %110 = vector.broadcast %109 : vector<8x1xf32> to vector<8x16xf32>
    %111 = arith.subf %107, %110 : vector<8x16xf32>
    %112 = math.exp %111 : vector<8x16xf32>
    %cst_55 = arith.constant dense<0.000000e+00> : vector<8xf32>
    %113 = vector.multi_reduction <add>, %112, %cst_55 [1] : vector<8x16xf32> to vector<8xf32>
    %114 = vector.shape_cast %113 : vector<8xf32> to vector<8x1xf32>
    %115 = tpu.reciprocal %114 {approx = true} : vector<8x1xf32> -> vector<8x1xf32>
    %116 = vector.broadcast %115 : vector<8x1xf32> to vector<8x16xf32>
    %117 = arith.mulf %112, %116 : vector<8x16xf32>
    %118 = arith.truncf %117 : vector<8x16xf32> to vector<8x16xbf16>
    %c0_56 = arith.constant 0 : index
    %c20_57 = arith.constant 20 : index
    %119 = vector.load %arg19[%c0_56, %c20_57] : memref<16x32xbf16, #tpu.memory_space<vmem>>, vector<16x4xbf16>
    "tpu.trace_start"() <{level = 10 : i32, message = "qk,kd->qd"}> : () -> ()
    %cst_58 = arith.constant dense<0.000000e+00> : vector<8x4xf32>
    %120 = tpu.matmul %118, %119, %cst_58 {dimension_numbers = #tpu.dot_dimension_numbers<[1], [0], [0], [1], [0, 0, 1, 1], [], []>} : vector<8x16xbf16>, vector<16x4xbf16>, vector<8x4xf32> -> vector<8x4xf32>
    "tpu.trace_stop"() : () -> ()
    %c0_59 = arith.constant 0 : index
    %c20_60 = arith.constant 20 : index
    %121 = vector.load %arg20[%c0_59, %c20_60] : memref<8x32xf32, #tpu.memory_space<vmem>>, vector<8x4xf32>
    tpu.vector_store %arg20[%c0_59, %c20_60], %120 {strides = array<i32>} : memref<8x32xf32, #tpu.memory_space<vmem>>, vector<8x4xf32>,
    %122 = vector.extract_strided_slice %7 {offsets = [0, 24], sizes = [8, 4], strides = [1, 1]} : vector<8x32xbf16> to vector<8x4xbf16>
    %c0_61 = arith.constant 0 : index
    %c24 = arith.constant 24 : index
    %123 = vector.load %arg18[%c0_61, %c24] : memref<16x32xbf16, #tpu.memory_space<vmem>>, vector<16x4xbf16>
    "tpu.trace_start"() <{level = 10 : i32, message = "qd,kd->qk"}> : () -> ()
    %cst_62 = arith.constant dense<0.000000e+00> : vector<8x16xf32>
    %124 = tpu.matmul %122, %123, %cst_62 {dimension_numbers = #tpu.dot_dimension_numbers<[1], [1], [0], [0], [0, 0, 1, 0], [], []>} : vector<8x4xbf16>, vector<16x4xbf16>, vector<8x16xf32> -> vector<8x16xf32>
    "tpu.trace_stop"() : () -> ()
    %cst_63 = arith.constant 5.000000e-01 : f32
    %125 = vector.broadcast %cst_63 : f32 to vector<8x16xf32>
    %126 = arith.mulf %124, %125 : vector<8x16xf32>
    %cst_64 = arith.constant dense<0xFF800000> : vector<8xf32>
    %127 = vector.multi_reduction <maximumf>, %126, %cst_64 [1] : vector<8x16xf32> to vector<8xf32>
    %128 = vector.shape_cast %127 : vector<8xf32> to vector<8x1xf32>
    %129 = vector.broadcast %128 : vector<8x1xf32> to vector<8x16xf32>
    %130 = arith.subf %126, %129 : vector<8x16xf32>
    %131 = math.exp %130 : vector<8x16xf32>
    %cst_65 = arith.constant dense<0.000000e+00> : vector<8xf32>
    %132 = vector.multi_reduction <add>, %131, %cst_65 [1] : vector<8x16xf32> to vector<8xf32>
    %133 = vector.shape_cast %132 : vector<8xf32> to vector<8x1xf32>
    %134 = tpu.reciprocal %133 {approx = true} : vector<8x1xf32> -> vector<8x1xf32>
    %135 = vector.broadcast %134 : vector<8x1xf32> to vector<8x16xf32>
    %136 = arith.mulf %131, %135 : vector<8x16xf32>
    %137 = arith.truncf %136 : vector<8x16xf32> to vector<8x16xbf16>
    %c0_66 = arith.constant 0 : index
    %c24_67 = arith.constant 24 : index
    %138 = vector.load %arg19[%c0_66, %c24_67] : memref<16x32xbf16, #tpu.memory_space<vmem>>, vector<16x4xbf16>
    "tpu.trace_start"() <{level = 10 : i32, message = "qk,kd->qd"}> : () -> ()
    %cst_68 = arith.constant dense<0.000000e+00> : vector<8x4xf32>
    %139 = tpu.matmul %137, %138, %cst_68 {dimension_numbers = #tpu.dot_dimension_numbers<[1], [0], [0], [1], [0, 0, 1, 1], [], []>} : vector<8x16xbf16>, vector<16x4xbf16>, vector<8x4xf32> -> vector<8x4xf32>
    "tpu.trace_stop"() : () -> ()
    %c0_69 = arith.constant 0 : index
    %c24_70 = arith.constant 24 : index
    %140 = vector.load %arg20[%c0_69, %c24_70] : memref<8x32xf32, #tpu.memory_space<vmem>>, vector<8x4xf32>
    tpu.vector_store %arg20[%c0_69, %c24_70], %139 {strides = array<i32>} : memref<8x32xf32, #tpu.memory_space<vmem>>, vector<8x4xf32>,
    %141 = vector.extract_strided_slice %7 {offsets = [0, 28], sizes = [8, 4], strides = [1, 1]} : vector<8x32xbf16> to vector<8x4xbf16>
    %c0_71 = arith.constant 0 : index
    %c28 = arith.constant 28 : index
    %142 = vector.load %arg18[%c0_71, %c28] : memref<16x32xbf16, #tpu.memory_space<vmem>>, vector<16x4xbf16>
    "tpu.trace_start"() <{level = 10 : i32, message = "qd,kd->qk"}> : () -> ()
    %cst_72 = arith.constant dense<0.000000e+00> : vector<8x16xf32>
    %143 = tpu.matmul %141, %142, %cst_72 {dimension_numbers = #tpu.dot_dimension_numbers<[1], [1], [0], [0], [0, 0, 1, 0], [], []>} : vector<8x4xbf16>, vector<16x4xbf16>, vector<8x16xf32> -> vector<8x16xf32>
    "tpu.trace_stop"() : () -> ()
    %cst_73 = arith.constant 5.000000e-01 : f32
    %144 = vector.broadcast %cst_73 : f32 to vector<8x16xf32>
    %145 = arith.mulf %143, %144 : vector<8x16xf32>
    %cst_74 = arith.constant dense<0xFF800000> : vector<8xf32>
    %146 = vector.multi_reduction <maximumf>, %145, %cst_74 [1] : vector<8x16xf32> to vector<8xf32>
    %147 = vector.shape_cast %146 : vector<8xf32> to vector<8x1xf32>
    %148 = vector.broadcast %147 : vector<8x1xf32> to vector<8x16xf32>
    %149 = arith.subf %145, %148 : vector<8x16xf32>
    %150 = math.exp %149 : vector<8x16xf32>
    %cst_75 = arith.constant dense<0.000000e+00> : vector<8xf32>
    %151 = vector.multi_reduction <add>, %150, %cst_75 [1] : vector<8x16xf32> to vector<8xf32>
    %152 = vector.shape_cast %151 : vector<8xf32> to vector<8x1xf32>
    %153 = tpu.reciprocal %152 {approx = true} : vector<8x1xf32> -> vector<8x1xf32>
    %154 = vector.broadcast %153 : vector<8x1xf32> to vector<8x16xf32>
    %155 = arith.mulf %150, %154 : vector<8x16xf32>
    %156 = arith.truncf %155 : vector<8x16xf32> to vector<8x16xbf16>
    %c0_76 = arith.constant 0 : index
    %c28_77 = arith.constant 28 : index
    %157 = vector.load %arg19[%c0_76, %c28_77] : memref<16x32xbf16, #tpu.memory_space<vmem>>, vector<16x4xbf16>
    "tpu.trace_start"() <{level = 10 : i32, message = "qk,kd->qd"}> : () -> ()
    %cst_78 = arith.constant dense<0.000000e+00> : vector<8x4xf32>
    %158 = tpu.matmul %156, %157, %cst_78 {dimension_numbers = #tpu.dot_dimension_numbers<[1], [0], [0], [1], [0, 0, 1, 1], [], []>} : vector<8x16xbf16>, vector<16x4xbf16>, vector<8x4xf32> -> vector<8x4xf32>
    "tpu.trace_stop"() : () -> ()
    %c0_79 = arith.constant 0 : index
    %c28_80 = arith.constant 28 : index
    %159 = vector.load %arg20[%c0_79, %c28_80] : memref<8x32xf32, #tpu.memory_space<vmem>>, vector<8x4xf32>
    tpu.vector_store %arg20[%c0_79, %c28_80], %158 {strides = array<i32>} : memref<8x32xf32, #tpu.memory_space<vmem>>, vector<8x4xf32>,
    %c0_81 = arith.constant 0 : index
    %c0_82 = arith.constant 0 : index
    %c0_83 = arith.constant 0 : index
    %160 = vector.load %arg2[%c0_81, %c0_82, %c0_83] : memref<1x8x32xf32, #tpu.memory_space<vmem>>, vector<1x8x32xf32>
    %161 = vector.shape_cast %160 : vector<1x8x32xf32> to vector<8x32xf32>
    %c0_84 = arith.constant 0 : index
    %c0_85 = arith.constant 0 : index
    %162 = vector.load %arg20[%c0_84, %c0_85] : memref<8x32xf32, #tpu.memory_space<vmem>>, vector<8x32xf32>
    %163 = arith.truncf %162 : vector<8x32xf32> to vector<8x32xbf16>
    %c0_86 = arith.constant 0 : index
    %c0_87 = arith.constant 0 : index
    %164 = vector.load %arg6[%c0_86, %c0_87] : memref<32x32xbf16, #tpu.memory_space<vmem>>, vector<32x32xbf16>
    %cst_88 = arith.constant dense<0.000000e+00> : vector<8x32xf32>
    %165 = tpu.matmul %163, %164, %cst_88 {dimension_numbers = #tpu.dot_dimension_numbers<[1], [0], [0], [1], [0, 0, 1, 1], [], []>} : vector<8x32xbf16>, vector<32x32xbf16>, vector<8x32xf32> -> vector<8x32xf32>
    %c0_89 = arith.constant 0 : index
    %c0_90 = arith.constant 0 : index
    %166 = vector.load %arg7[%c0_89, %c0_90] : memref<1x32xf32, #tpu.memory_space<vmem>>, vector<1x32xf32>
    %167 = vector.broadcast %166 : vector<1x32xf32> to vector<8x32xf32>
    %168 = arith.addf %165, %167 : vector<8x32xf32>
    %169 = arith.addf %161, %168 : vector<8x32xf32>
    %cst_91 = arith.constant dense<0.000000e+00> : vector<8xf32>
    %170 = vector.multi_reduction <add>, %169, %cst_91 [1] : vector<8x32xf32> to vector<8xf32>
    %171 = vector.shape_cast %170 : vector<8xf32> to vector<8x1xf32>
    %cst_92 = arith.constant 3.200000e+01 : f32
    %172 = vector.broadcast %cst_92 : f32 to vector<8x1xf32>
    %173 = arith.divf %171, %172 : vector<8x1xf32>
    %174 = vector.broadcast %173 : vector<8x1xf32> to vector<8x32xf32>
    %175 = arith.subf %169, %174 : vector<8x32xf32>
    %176 = arith.mulf %175, %175 : vector<8x32xf32>
    %cst_93 = arith.constant dense<0.000000e+00> : vector<8xf32>
    %177 = vector.multi_reduction <add>, %176, %cst_93 [1] : vector<8x32xf32> to vector<8xf32>
    %178 = vector.shape_cast %177 : vector<8xf32> to vector<8x1xf32>
    %cst_94 = arith.constant 3.200000e+01 : f32
    %179 = vector.broadcast %cst_94 : f32 to vector<8x1xf32>
    %180 = arith.divf %178, %179 : vector<8x1xf32>
    %181 = vector.broadcast %173 : vector<8x1xf32> to vector<8x32xf32>
    %182 = arith.subf %169, %181 : vector<8x32xf32>
    %cst_95 = arith.constant 9.99999974E-6 : f32
    %183 = vector.broadcast %cst_95 : f32 to vector<8x1xf32>
    %184 = arith.addf %180, %183 : vector<8x1xf32>
    %185 = math.rsqrt %184 : vector<8x1xf32>
    %186 = vector.broadcast %185 : vector<8x1xf32> to vector<8x32xf32>
    %187 = arith.mulf %182, %186 : vector<8x32xf32>
    %c0_96 = arith.constant 0 : index
    %c0_97 = arith.constant 0 : index
    %188 = vector.load %arg12[%c0_96, %c0_97] : memref<1x32xf32, #tpu.memory_space<vmem>>, vector<1x32xf32>
    %189 = vector.broadcast %188 : vector<1x32xf32> to vector<8x32xf32>
    %190 = arith.mulf %187, %189 : vector<8x32xf32>
    %c0_98 = arith.constant 0 : index
    %c0_99 = arith.constant 0 : index
    %191 = vector.load %arg13[%c0_98, %c0_99] : memref<1x32xf32, #tpu.memory_space<vmem>>, vector<1x32xf32>
    %192 = vector.broadcast %191 : vector<1x32xf32> to vector<8x32xf32>
    %193 = arith.addf %190, %192 : vector<8x32xf32>
    %194 = arith.truncf %193 : vector<8x32xf32> to vector<8x32xbf16>
    %c0_100 = arith.constant 0 : index
    %c0_101 = arith.constant 0 : index
    %195 = vector.load %arg8[%c0_100, %c0_101] : memref<32x64xbf16, #tpu.memory_space<vmem>>, vector<32x64xbf16>
    %cst_102 = arith.constant dense<0.000000e+00> : vector<8x64xf32>
    %196 = tpu.matmul %194, %195, %cst_102 {dimension_numbers = #tpu.dot_dimension_numbers<[1], [0], [0], [1], [0, 0, 1, 1], [], []>} : vector<8x32xbf16>, vector<32x64xbf16>, vector<8x64xf32> -> vector<8x64xf32>
    %c0_103 = arith.constant 0 : index
    %c0_104 = arith.constant 0 : index
    %197 = vector.load %arg9[%c0_103, %c0_104] : memref<1x64xf32, #tpu.memory_space<vmem>>, vector<1x64xf32>
    %198 = vector.broadcast %197 : vector<1x64xf32> to vector<8x64xf32>
    %199 = arith.addf %196, %198 : vector<8x64xf32>
    %cst_105 = arith.constant 0.000000e+00 : f32
    %200 = vector.broadcast %cst_105 : f32 to vector<8x64xf32>
    %201 = arith.maximumf %199, %200 : vector<8x64xf32>
    %202 = arith.truncf %201 : vector<8x64xf32> to vector<8x64xbf16>
    %c0_106 = arith.constant 0 : index
    %c0_107 = arith.constant 0 : index
    %203 = vector.load %arg10[%c0_106, %c0_107] : memref<64x32xbf16, #tpu.memory_space<vmem>>, vector<64x32xbf16>
    %cst_108 = arith.constant dense<0.000000e+00> : vector<8x32xf32>
    %204 = tpu.matmul %202, %203, %cst_108 {dimension_numbers = #tpu.dot_dimension_numbers<[1], [0], [0], [1], [0, 0, 1, 1], [], []>} : vector<8x64xbf16>, vector<64x32xbf16>, vector<8x32xf32> -> vector<8x32xf32>
    %c0_109 = arith.constant 0 : index
    %c0_110 = arith.constant 0 : index
    %205 = vector.load %arg11[%c0_109, %c0_110] : memref<1x32xf32, #tpu.memory_space<vmem>>, vector<1x32xf32>
    %206 = vector.broadcast %205 : vector<1x32xf32> to vector<8x32xf32>
    %207 = arith.addf %204, %206 : vector<8x32xf32>
    %208 = arith.addf %193, %207 : vector<8x32xf32>
    %cst_111 = arith.constant dense<0.000000e+00> : vector<8xf32>
    %209 = vector.multi_reduction <add>, %208, %cst_111 [1] : vector<8x32xf32> to vector<8xf32>
    %210 = vector.shape_cast %209 : vector<8xf32> to vector<8x1xf32>
    %cst_112 = arith.constant 3.200000e+01 : f32
    %211 = vector.broadcast %cst_112 : f32 to vector<8x1xf32>
    %212 = arith.divf %210, %211 : vector<8x1xf32>
    %213 = vector.broadcast %212 : vector<8x1xf32> to vector<8x32xf32>
    %214 = arith.subf %208, %213 : vector<8x32xf32>
    %215 = arith.mulf %214, %214 : vector<8x32xf32>
    %cst_113 = arith.constant dense<0.000000e+00> : vector<8xf32>
    %216 = vector.multi_reduction <add>, %215, %cst_113 [1] : vector<8x32xf32> to vector<8xf32>
    %217 = vector.shape_cast %216 : vector<8xf32> to vector<8x1xf32>
    %cst_114 = arith.constant 3.200000e+01 : f32
    %218 = vector.broadcast %cst_114 : f32 to vector<8x1xf32>
    %219 = arith.divf %217, %218 : vector<8x1xf32>
    %220 = vector.broadcast %212 : vector<8x1xf32> to vector<8x32xf32>
    %221 = arith.subf %208, %220 : vector<8x32xf32>
    %cst_115 = arith.constant 9.99999974E-6 : f32
    %222 = vector.broadcast %cst_115 : f32 to vector<8x1xf32>
    %223 = arith.addf %219, %222 : vector<8x1xf32>
    %224 = math.rsqrt %223 : vector<8x1xf32>
    %225 = vector.broadcast %224 : vector<8x1xf32> to vector<8x32xf32>
    %226 = arith.mulf %221, %225 : vector<8x32xf32>
    %c0_116 = arith.constant 0 : index
    %c0_117 = arith.constant 0 : index
    %227 = vector.load %arg14[%c0_116, %c0_117] : memref<1x32xf32, #tpu.memory_space<vmem>>, vector<1x32xf32>
    %228 = vector.broadcast %227 : vector<1x32xf32> to vector<8x32xf32>
    %229 = arith.mulf %226, %228 : vector<8x32xf32>
    %c0_118 = arith.constant 0 : index
    %c0_119 = arith.constant 0 : index
    %230 = vector.load %arg15[%c0_118, %c0_119] : memref<1x32xf32, #tpu.memory_space<vmem>>, vector<1x32xf32>
    %231 = vector.broadcast %230 : vector<1x32xf32> to vector<8x32xf32>
    %232 = arith.addf %229, %231 : vector<8x32xf32>
    %c0_120 = arith.constant 0 : index
    %c0_121 = arith.constant 0 : index
    %c0_122 = arith.constant 0 : index
    %233 = vector.load %arg16[%c0_120, %c0_121, %c0_122] : memref<1x8x32xf32, #tpu.memory_space<vmem>>, vector<1x8x32xf32>
    %234 = vector.shape_cast %233 : vector<1x8x32xf32> to vector<8x32xf32>
    %235 = vector.shape_cast %232 : vector<8x32xf32> to vector<1x8x32xf32>
    tpu.vector_store %arg16[%c0_120, %c0_121, %c0_122], %235 {strides = array<i32>} : memref<1x8x32xf32, #tpu.memory_space<vmem>>, vector<1x8x32xf32>,
    return
  }
  func.func @transform_0(%arg0: i32, %arg1: i32) -> (i32, i32, i32) {
    %c0_i32 = arith.constant 0 : i32
    %c0_i32_0 = arith.constant 0 : i32
    return %arg0, %arg1, %c0_i32 : i32, i32, i32
  }
  func.func @transform_1(%arg0: i32, %arg1: i32) -> (i32, i32, i32) {
    %c0_i32 = arith.constant 0 : i32
    %c0_i32_0 = arith.constant 0 : i32
    %c0_i32_1 = arith.constant 0 : i32
    return %arg0, %c0_i32, %c0_i32_0 : i32, i32, i32
  }
  func.func @transform_2(%arg0: i32, %arg1: i32) -> (i32, i32) {
    %c0_i32 = arith.constant 0 : i32
    %c0_i32_0 = arith.constant 0 : i32
    %c0_i32_1 = arith.constant 0 : i32
    return %c0_i32, %c0_i32_0 : i32, i32
  }
  func.func @transform_3(%arg0: i32, %arg1: i32) -> (i32, i32) {
    %c0_i32 = arith.constant 0 : i32
    %c0_i32_0 = arith.constant 0 : i32
    %c0_i32_1 = arith.constant 0 : i32
    return %c0_i32, %c0_i32_0 : i32, i32
  }
  func.func @transform_4(%arg0: i32, %arg1: i32) -> (i32, i32) {
    %c0_i32 = arith.constant 0 : i32
    %c0_i32_0 = arith.constant 0 : i32
    %c0_i32_1 = arith.constant 0 : i32
    return %c0_i32, %c0_i32_0 : i32, i32
  }
  func.func @transform_5(%arg0: i32, %arg1: i32) -> (i32, i32) {
    %c0_i32 = arith.constant 0 : i32
    %c0_i32_0 = arith.constant 0 : i32
    %c0_i32_1 = arith.constant 0 : i32
    return %c0_i32, %c0_i32_0 : i32, i32
  }
  func.func @transform_6(%arg0: i32, %arg1: i32) -> (i32, i32) {
    %c0_i32 = arith.constant 0 : i32
    %c0_i32_0 = arith.constant 0 : i32
    %c0_i32_1 = arith.constant 0 : i32
    return %c0_i32, %c0_i32_0 : i32, i32
  }
  func.func @transform_7(%arg0: i32, %arg1: i32) -> (i32, i32) {
    %c0_i32 = arith.constant 0 : i32
    %c0_i32_0 = arith.constant 0 : i32
    %c0_i32_1 = arith.constant 0 : i32
    return %c0_i32, %c0_i32_0 : i32, i32
  }
  func.func @transform_8(%arg0: i32, %arg1: i32) -> (i32, i32) {
    %c0_i32 = arith.constant 0 : i32
    %c0_i32_0 = arith.constant 0 : i32
    %c0_i32_1 = arith.constant 0 : i32
    return %c0_i32, %c0_i32_0 : i32, i32
  }
  func.func @transform_9(%arg0: i32, %arg1: i32) -> (i32, i32) {
    %c0_i32 = arith.constant 0 : i32
    %c0_i32_0 = arith.constant 0 : i32
    %c0_i32_1 = arith.constant 0 : i32
    return %c0_i32, %c0_i32_0 : i32, i32
  }
  func.func @transform_10(%arg0: i32, %arg1: i32) -> (i32, i32) {
    %c0_i32 = arith.constant 0 : i32
    %c0_i32_0 = arith.constant 0 : i32
    %c0_i32_1 = arith.constant 0 : i32
    return %c0_i32, %c0_i32_0 : i32, i32
  }
  func.func @transform_11(%arg0: i32, %arg1: i32) -> (i32, i32) {
    %c0_i32 = arith.constant 0 : i32
    %c0_i32_0 = arith.constant 0 : i32
    %c0_i32_1 = arith.constant 0 : i32
    return %c0_i32, %c0_i32_0 : i32, i32
  }
  func.func @transform_12(%arg0: i32, %arg1: i32) -> (i32, i32) {
    %c0_i32 = arith.constant 0 : i32
    %c0_i32_0 = arith.constant 0 : i32
    %c0_i32_1 = arith.constant 0 : i32
    return %c0_i32, %c0_i32_0 : i32, i32
  }
  func.func @transform_13(%arg0: i32, %arg1: i32) -> (i32, i32) {
    %c0_i32 = arith.constant 0 : i32
    %c0_i32_0 = arith.constant 0 : i32
    %c0_i32_1 = arith.constant 0 : i32
    return %c0_i32, %c0_i32_0 : i32, i32
  }
  func.func @transform_14(%arg0: i32, %arg1: i32) -> (i32, i32, i32) {
    %c0_i32 = arith.constant 0 : i32
    %c0_i32_0 = arith.constant 0 : i32
    return %arg0, %arg1, %c0_i32 : i32, i32, i32
  }
}

</mosaic_0001>

<bundles_post_ra>
// kernel: tpu_custom_call.1
= control target key start
LH: loop header
LB: loop body
LE: loop exit
PB: predicated region body
PF: predicated region fallthrough
CT: control target
= control target key end

     0   :  { %s3294_s0 = inlined_call_operand.vmem [shape: f32[2,16,32], index: 0, kind: input, shape index: {}]   ;;  %s3295_s1 = inlined_call_operand.hbm [shape: f32[2,16,32], index: 1, kind: input, shape index: {}]   ;;  %s3296_s2 = inlined_call_operand.vmem [shape: bf16[32,96], index: 2, kind: input, shape index: {}]   ;;  %s3297_s3 = inlined_call_operand.vmem [shape: f32[1,96], index: 3, kind: input, shape index: {}]   ;;  %s3298_s4 = inlined_call_operand.hbm [shape: bf16[32,32], index: 4, kind: input, shape index: {}]   ;;  %s3299_s5 = inlined_call_operand.vmem [shape: f32[1,32], index: 5, kind: input, shape index: {}]   ;;  %s3300_s6 = inlined_call_operand.hbm [shape: bf16[32,64], index: 6, kind: input, shape index: {}]   ;;  %s3301_s7 = inlined_call_operand.vmem [shape: f32[1,64], index: 7, kind: input, shape index: {}]   ;;  %s3302_s8 = inlined_call_operand.vmem [shape: bf16[64,32], index: 8, kind: input, shape index: {}]   ;;  %s3303_s9 = inlined_call_operand.vmem [shape: f32[1,32], index: 9, kind: input, shape index: {}]   ;;  %s3304_s10 = inlined_call_operand.vmem [shape: f32[1,32], index: 10, kind: input, shape index: {}]   ;;  %s3305_s11 = inlined_call_operand.vmem [shape: f32[1,32], index: 11, kind: input, shape index: {}]   ;;  %s3306_s12 = inlined_call_operand.vmem [shape: f32[1,32], index: 12, kind: input, shape index: {}]   ;;  %s3307_s13 = inlined_call_operand.vmem [shape: f32[1,32], index: 13, kind: input, shape index: {}]   ;;  %s3308_s14 = inlined_call_operand.hbm [shape: f32[2,16,32], index: 14, kind: output, shape index: {}]  }
   0x1   :  { %3323 = sst [smem:[#allocation21_spill]] %s3294_s0 }
   0x2   :  { %3324 = sst [smem:[#allocation22_spill]] %s3297_s3 }
   0x3   :  { %3325 = sst [smem:[#allocation23_spill]] %s3298_s4 }
   0x4   :  { %3326 = sst [smem:[#allocation24_spill]] %s3299_s5 }
   0x5   :  { %3327 = sst [smem:[#allocation25_spill]] %s3300_s6 }
   0x6   :  { %3328 = sst [smem:[#allocation26_spill]] %s3301_s7 }
   0x7   :  { %3329 = sst [smem:[#allocation27_spill]] %s3302_s8 }
   0x8   :  { %3330 = sst [smem:[#allocation28_spill]] %s3303_s9 }
   0x9   :  { %3331 = sst [smem:[#allocation29_spill]] %s3304_s10 }
   0xa   :  { %3332 = sst [smem:[#allocation30_spill]] %s3305_s11 }
   0xb   :  { %3333 = sst [smem:[#allocation31_spill]] %s3306_s12 }
   0xc   :  { %3334 = sst [smem:[#allocation32_spill]] %s3307_s13 }
   0xd   :  { %3335 = sst [smem:[#allocation33_spill]] %s3308_s14 }
   0xe   :  { %19 = vsyncpa [#allocation7], 0 }
   0xf   :  { %21 = vsyncpa [#allocation7 + $0x1], 0 }
  0x10   :  { %22 = vsyncpa [#allocation10], 0 }
  0x11   :  { %23 = vsyncpa [#allocation8], 0 }
  0x12   :  { %25 = vsyncpa [#allocation8 + $0x1], 0  ;;  %s2765_s29 = smov 0   ;;  %s2767_s30 = smov 0  }
  0x13   :  { %s2769_s15 = smov 0   ;;  %s2771_s16 = smov 0  }
  0x14   :  { %s2773_s17 = smov 0   ;;  %s2775_s18 = smov 0  }
  0x15   :  { %s2777_s19 = smov 0   ;;  %s2779_s20 = smov 0  }
  0x16   :  { %s2781_s21 = smov 0   ;;  %s2783_s22 = smov 0  }
  0x17   :  { %3336 = sst [smem:[#allocation16_spill]] %s2781_s21  ;;  %s2785_s23 = smov 0  }
  0x18 LB: > { %s3338_s21 = sld [smem:[#allocation16_spill]]  ;;  %s2015_s24 = sadd.s32 4294967295, %s2660_s23   ;;  %s2660_s23 = sphi %s2785_s23, %s31_s23   ;;  %s2656_s22 = sphi %s2783_s22, %s3386_s22   ;;  %s2648_s20 = sphi %s2779_s20, %s3384_s20   ;;  %s2644_s19 = sphi %s2777_s19, %s3376_s19   ;;  %s2640_s18 = sphi %s2775_s18, %s3383_s18   ;;  %s2636_s17 = sphi %s2773_s17, %s3382_s17   ;;  %s2632_s16 = sphi %s2771_s16, %s3381_s16   ;;  %s2628_s15 = sphi %s2769_s15, %s3380_s15   ;;  %s2624_s30 = sphi %s2767_s30, %s3379_s30   ;;  %s2620_s29 = sphi %s2765_s29, %s3378_s29  }
  0x19   : > { %3339 = sst [smem:[#allocation16_spill]] %s2620_s29  ;;  %s2016_s25 = sadd.s32 4294967294, %s2660_s23  }
  0x1a   : > { %p91_p0 = scmp.ne.s32.totalorder %s2636_s17, %s2632_s16  ;;  %p2821_p1 = scmp.eq.s32.totalorder %s2015_s24, 0 }
  0x1b   : > { %p368_p2 = scmp.ne.s32.totalorder %s2628_s15, %s2624_s30  ;;  %p369_p4 = scmp.eq.s32.totalorder %s2015_s24, 3 }
  0x1c   : > { %s3341_s26 = scalar_select %p2821_p1, 1, 0 }
  0x1d   : > { %p2830_p3 = por %p2821_p1, %p91_p0  ;;  %p374_p5 = scmp.ne.s32.totalorder %s2624_s30, %s2620_s29 }
  0x1e   : > { %3340 = sst [smem:[#allocation17_spill]] %s3338_s21  ;;  %p375_p6 = scmp.eq.s32.totalorder %s2016_s25, 3 }
  0x1f   : > { %s3342_s28 = scalar_select %p2830_p3, 1, 0 }
  0x20   : > { %p2836_p7 = por %p369_p4, %p368_p2  ;;  %p2017_p8 = scmp.ge.s32.totalorder %s2660_s23, 1 }
  0x21   : > { %p2841_p9 = por %p375_p6, %p374_p5  ;;  %p382_p10 = scmp.lt.s32.totalorder %s2660_s23, 5 }
  0x22   : > { %s3343_s14 = scalar_select %p2836_p7, 1, 0 }
  0x23   : > { %s3345_s16 = scalar_select %p2841_p9, 1, 0 }
  0x24   : > { %3344 = sst [smem:[#allocation18_spill]] %s3343_s14  ;;  %p2846_p11 = pnand %p2017_p8, %p382_p10 }
  0x25   : > { %3346 = sst [smem:[#allocation19_spill]] %s3345_s16  ;;  %s2662_s13 = smov [#allocation9]  }
  0x26   : > { %s3347_s27 = scalar_select %p2846_p11, 1, 0 }
  0x27   : > { %s400_s12 = sshll.u32 %s2662_s13, 4  ;;  %p2267_p12 = pneg %p2846_p11  ;;  %s401_s12 = int_to_ptr.vmem [resolvable:$true] %s400_s12 }
  0x28   : > { %s2663_s25 = smov [#allocation11]   ;;  %s3349_s4 = sld [smem:[#allocation23_spill]] }
  0x29   : > { %p2854_p13 = pnand %p2267_p12, %p2821_p1  ;;  %s416_s16 = sshll.u32 %s2663_s25, 4  ;;  %s2858_s16 = int_to_ptr.vmem [resolvable:$true] %s416_s16 }
  0x2b   : > { %p2450_p2 = pneg %p2854_p13 }
  0x2e   : > { %s2448_s9 = scalar_lea.hbm %s3349_s4, 256 }
  0x2f   : > { %p2449_p0 = scmp.ne.s32.totalorder %s3349_s4, %s2448_s9  ;;  %p2455_p6 = scmp.lt.u32.totalorder %s2448_s9, %s3349_s4 }
  0x31   : > { %p2451_p4 = pnand %p2450_p2, %p2449_p0 }
  0x33   : > { %p2452_p5 = pneg %p2451_p4 }
  0x35   : > { %p2457_p8 = pnand %p2455_p6, %p2452_p5 }
  0x37   : > { %2460 = shalt.err (!%p2457_p8)
}
  0x38   : > { %s2461_s25 = scalar_lea.vmem %s401_s12, 256  ;;  %p2469_p7 = scmp.lt.s32.totalorder %s401_s12, %s401_s12 }
  0x39   : > { %p2462_p10 = scmp.ne.s32.totalorder %s401_s12, %s2461_s25  ;;  %p2470_p1 = scmp.lt.s32.totalorder %s2461_s25, %s2461_s25 }
  0x3b   : > { %p2464_p12 = pnand %p2462_p10, %p2450_p2  ;;  %p2471_p3 = por %p2470_p1, %p2469_p7 }
  0x3d   : > { %p2465_p9 = pneg %p2464_p12 }
  0x3f   : > { %p2472_p11 = pnand %p2471_p3, %p2465_p9 }
  0x41   : > { %2475 = shalt.err (!%p2472_p11)
}
  0x42   : > { %s2664_s7 = smov 64   ;;  %s2665_s14 = smov 4  }
  0x43   : > { %2270 = dma.hbm_to_vmem [thread:$0]  (!%p2854_p13), %s3349_s4, 256, %s401_s12, [#allocation10], %s2664_s7, %s2664_s7, %s2665_s14  }
  0x44   : > { %s3350_s6 = sld [smem:[#allocation25_spill]] }
  0x4a   : > { %s2476_s13 = scalar_lea.hbm %s3350_s6, 256 }
  0x4b   : > { %p2477_p0 = scmp.ne.s32.totalorder %s3350_s6, %s2476_s13  ;;  %p2483_p7 = scmp.lt.u32.totalorder %s2476_s13, %s3350_s6 }
  0x4d   : > { %p2479_p1 = pnand %p2477_p0, %p2450_p2 }
  0x4f   : > { %p2480_p3 = pneg %p2479_p1 }
  0x51   : > { %p2485_p9 = pnand %p2483_p7, %p2480_p3 }
  0x53   : > { %2488 = shalt.err (!%p2485_p9)
}
  0x54   : > { %s2489_s12 = scalar_lea.vmem %s2858_s16, 256  ;;  %p2497_p6 = scmp.lt.s32.totalorder %s2858_s16, %s2858_s16 }
  0x55   : > { %p2490_p11 = scmp.ne.s32.totalorder %s2858_s16, %s2489_s12  ;;  %p2498_p8 = scmp.lt.s32.totalorder %s2489_s12, %s2489_s12 }
  0x57   : > { %p2492_p4 = pnand %p2490_p11, %p2450_p2  ;;  %p2499_p10 = por %p2498_p8, %p2497_p6 }
  0x59   : > { %p2493_p5 = pneg %p2492_p4 }
  0x5b   : > { %p2500_p12 = pnand %p2499_p10, %p2493_p5 }
  0x5d   : > { %2503 = shalt.err (!%p2500_p12)
}
  0x5e   : > { %2273 = dma.hbm_to_vmem [thread:$0]  (!%p2854_p13), %s3350_s6, 256, %s2858_s16, [#allocation10], %s2664_s7, %s2664_s7, %s2665_s14  }
  0x5f   : > { %s40_s8 = sadd.s32 1, %s3338_s21  ;;  %s43_s9 = sadd.s32 1, %s2656_s22 }
  0x60   : > { %p41_p2 = scmp.ge.s32.totalorder %s40_s8, 2  ;;  %s78_s24 = sadd.s32 1, %s2640_s18 }
  0x61   : > { %p85_p0 = scmp.ne.s32.totalorder %s2640_s18, %s2636_s17  ;;  %p86_p1 = scmp.eq.s32.totalorder %s2660_s23, 0 }
  0x62   : > { %s3388_s8 = smov (%p41_p2, %s40_s8), 0  ;;  %s3390_s9 = smov (!%p41_p2, %s43_s9), %s2656_s22 }
  0x63   : > { %3351 = sst [smem:[#allocation20_spill]] %s3388_s8  ;;  %p2916_p3 = por %p86_p1, %p85_p0 }
  0x64   : > { %s354_s11 = ssub.s32 %s3338_s21, %s3388_s8  ;;  %p45_p13 = scmp.ge.s32.totalorder %s3390_s9, 2 }
  0x65   : > { %p2284_p7 = scmp.lt.s32.totalorder %s2660_s23, 4  ;;  %s462_s16 = sand.u32 1, %s2640_s18  }
  0x66   : > { %s2076_s7 = sshll.u32 %s2656_s22, 8  ;;  %s3392_s9 = smov (%p45_p13, %s3390_s9), 0 }
  0x67   : > { %s2021_s14 = sshll.u32 %s462_s16, 4  ;;  %s75_s29 = ssub.s32 %s2656_s22, %s3392_s9 }
  0x68   : > { %p76_p9 = scmp.eq.s32.totalorder %s75_s29, 0  ;;  %s355_s13 = sor.u32 %s354_s11, %s75_s29 }
  0x69   : > { %p356_p11 = scmp.eq.s32.totalorder %s355_s13, 0  ;;  %s2932_s3 = scalar_lea.hbm %s3295_s1, %s2076_s7 }
  0x6a   : > { %s2935_s5 = scalar_select %p76_p9, %s2640_s18, %s78_s24  }
  0x6b   : > { %s3353_s4 = sadd.s32 1, %s2628_s15  ;;  %s466_s8 = scalar_lea.vmem [#allocation6], %s2021_s14 }
  0x6c   : > { %s2940_s6 = scalar_select %p356_p11, %s2628_s15, %s3353_s4  }
  0x6d   : > { %s473_s21 = sshll.u32 %s466_s8, 4  ;;  %p2946_p4 = pnand %p2284_p7, %p2916_p3  ;;  %s2950_s21 = int_to_ptr.vmem [resolvable:$true] %s473_s21 }
  0x6e   : > { %s2952_s7 = scalar_lea.sflag [#allocation7], %s462_s16  ;;  %s2504_s24 = scalar_lea.hbm %s2932_s3, 256 }
  0x6f   : > { %p2505_p5 = scmp.ne.s32.totalorder %s2932_s3, %s2504_s24  ;;  %p2506_p6 = pneg %p2946_p4 }
  0x70   : > { %s2509_s10 = scalar_lea.hbm %s3295_s1, 512  ;;  %p2510_p12 = scmp.lt.u32.totalorder %s2932_s3, %s3295_s1 }
  0x71   : > { %p2507_p8 = pnand %p2506_p6, %p2505_p5  ;;  %p2511_p2 = scmp.lt.u32.totalorder %s2509_s10, %s2504_s24 }
  0x72   : > { %p2513_p1 = scmp.lt.u32.totalorder %s2504_s24, %s2932_s3 }
  0x73   : > { %p2508_p10 = pneg %p2507_p8  ;;  %p2512_p0 = por %p2511_p2, %p2510_p12 }
  0x75   : > { %p2514_p3 = por %p2513_p1, %p2512_p0 }
  0x77   : > { %p2515_p13 = pnand %p2514_p3, %p2508_p10 }
  0x79   : > { %2518 = shalt.err (!%p2515_p13)
}
  0x7a   : > { %s2519_s16 = scalar_lea.vmem %s2950_s21, 256  ;;  %s2666_s13 = smov [#allocation6]  }
  0x7b   : > { %p2520_p7 = scmp.ne.s32.totalorder %s2950_s21, %s2519_s16  ;;  %s2524_s25 = sshll.u32 %s2666_s13, 4  ;;  %s2525_s25 = int_to_ptr.vmem [resolvable:$false] %s2524_s25 }
  0x7c   : > { %s2526_s12 = scalar_lea.vmem %s2525_s25, 512  ;;  %p2527_p5 = scmp.lt.s32.totalorder %s2950_s21, %s2525_s25 }
  0x7d   : > { %p2522_p9 = pnand %p2520_p7, %p2506_p6  ;;  %p2528_p8 = scmp.lt.s32.totalorder %s2526_s12, %s2519_s16 }
  0x7f   : > { %p2523_p11 = pneg %p2522_p9  ;;  %p2529_p12 = por %p2528_p8, %p2527_p5 }
  0x81   : > { %p2530_p2 = pnand %p2529_p12, %p2523_p11 }
  0x83   : > { %2533 = shalt.err (!%p2530_p2)
}
  0x84   : > { %s2667_s24 = smov 128   ;;  %s2668_s4 = smov 8  }
  0x85   : > { %2277 = dma.hbm_to_vmem [thread:$0]  (!%p2946_p4), %s2932_s3, 256, %s2950_s21, %s2952_s7, %s2667_s24, %s2667_s24, %s2668_s4  }
  0x86   : > { %p3355_p6 = scmp.ne.s32.totalorder %s3347_s27, 0 }
  0x87   : > { %s487_s8 = sand.u32 (!%p3355_p6), 1, %s2636_s17   ;;  %p3356_p10 = scmp.ne.s32.totalorder (!%p3355_p6), %s3342_s28, 0 }
  0x88   : > { %485 = sbr.rel (%p3355_p6) target bundleno = 2871 (0xb37), region = 76  ;;  %s2025_s10 = sshll.u32 (!%p3355_p6), %s487_s8, 4 }
  0x89   : > { %s488_s14 = scalar_lea.sflag (!%p3355_p6), [#allocation7], %s487_s8  ;;  %s491_s29 = scalar_lea.vmem (!%p3355_p6), [#allocation6], %s2025_s10 }
  0x8f   : > { %2607 = dma.done.wait (%p3356_p10), %s488_s14, 256  }
  0x90   : > { %2609 = vsyncadd (%p3356_p10), %s488_s14, 4294967040  ;;  %p3357_p0 = scmp.ne.s32.totalorder %s3341_s26, 0 }
  0x92   : > { %2611 = dma.done.wait (%p3357_p0), [#allocation10], 512  }
  0x93   : > { %2613 = vsyncadd (%p3357_p0), [#allocation10], 4294966784  ;;  %s3322_s21 = sand.u32 1, %s2624_s30   ;;  %p552_p4 = scmp.lt.s32.totalorder %s2648_s20, 1 }
  0x94   : > { %s2995_s27 = sshll.u32 %s3322_s21, 3  ;;  %p554_p1 = scmp.lt.s32.totalorder %s2644_s19, 1 }
  0x95   : > { %s553_s28 = scalar_select %p552_p4, %s2648_s20, 1 }
  0x96   : > { %s555_s3 = scalar_select %p554_p1, %s2644_s19, 1 }
  0x97   : > { %s2029_s11 = sshll.u32 %s553_s28, 1  ;;  %s3358_s0 = sld [smem:[#allocation21_spill]] }
  0x98   : > { %s557_s7 = sadd.s32 %s2029_s11, %s555_s3  ;;  %s551_s12 = scalar_lea.vmem [#allocation12], %s2995_s27 }
  0x99   : > { %s2030_s16 = sshll.u32 %s557_s7, 3  ;;  %p2031_p3 = scmp.ne.s32.totalorder %s2644_s19, 0 }
  0x9a   : > { %v2402_v0 = vld [vmem:[%s3296_s2] sm:$0xff] (!%p2031_p3)   ;;  %v2669_v1 = vmov (!%p2031_p3), 0.0   ;;  %v2403_v2 = vld [vmem:[%s3296_s2 + $0x8] sm:$0xff] (!%p2031_p3)   ;;  %vm2670_vm0 = vmmov (!%p2031_p3), 0   ;;  %vm591_vm1 = vcmask (!%p2031_p3), 261120   ;;  %s3359_s3 = sld [smem:[#allocation22_spill]] (!%p2031_p3) }
  0x9b   : > { %564 = sbr.rel (%p2031_p3) target bundleno = 501 (0x1f5), region = 92  ;;  %2123 = vmatprep.subr.bf16.mxu0 (!%p2031_p3), %v2669_v1  ;;  %2127 = vmatprep.mubr.msk.bf16.mxu0 (!%p2031_p3), %vm2670_vm0, %v2669_v1  ;;  %v565_v3 = vld [vmem:[%s491_s29] sm:$0xff] (!%p2031_p3)  ;;  %v566_v4 = vld [vmem:[%s491_s29 + $0x8] sm:$0xff] (!%p2031_p3)  ;;  %s2671_s29 = smov (!%p2031_p3), 96  }
  0x9c   : > { %2124 = vmatpush3.bf16.msra.mxu0 (!%p2031_p3), %v2402_v0  ;;  %v567_v5 = vpack.c.bf16 (!%p2031_p3), %v566_v4, %v565_v3  ;;  %s2672_s11 = smov (!%p2031_p3), 64  }
  0x9d   : > { %s3003_s25 = scalar_lea.vmem %s3358_s0, %s2030_s16  ;;  %2125 = vmatprep.subr.bf16.mxu0 (!%p2031_p3), %v2669_v1 }
  0xa0   : > { %2126 = vmatpush3.bf16.msra.mxu0 (!%p2031_p3), %v2403_v2  ;;  %v2032_v6 = vld [vmem:[%s3359_s3] ss:$0 sm:$0xff] (!%p2031_p3) }
  0xa3   : > { %2128 = vmatmul.mubr.msk.bf16.vlgmr.msra.gmra.mrb[0].mxu0 %vm591_vm1, %v567_v5 }
 0x176   : > { %v629_v7 = vpop.f32.mrb[0].mxu0 }
 0x177   : > { %v630_v8 = vadd.f32 %v2032_v6, %v629_v7  ;;  %v2129_v9 = vpop.f32.mrb[1].mxu0 }
 0x178   : > { %v632_v10 = vpop.f32.mrb[2].mxu0 }
 0x179   : > { %636 = vst.msk [vmem:[#allocation2] sm:$0xff] %vm591_vm1, %v630_v8  ;;  %v633_v11 = vadd.f32 %v2032_v6, %v632_v10  ;;  %v2130_v12 = vpop.f32.mrb[3].mxu0 }
 0x17b   : > { %637 = vst.msk [vmem:[#allocation2 + $0x8] sm:$0xff] %vm591_vm1, %v633_v11  ;;  %v638_v13 = vpack.c.bf16 %v633_v11, %v630_v8 }
 0x17d   : > { %640 = vrot.lane.b32.xlu0 %v638_v13, %s2671_s29 }
 0x181   : > { %644 = vrot.lane.b32.xlu0 %v638_v13, %s2672_s11 }
 0x1ef   : > { %v641_v14 = vpop.permute.xlu0 %640 }
 0x1f0   : > { %643 = vst.msk [vmem:[#allocation3] sm:$0xff] %vm591_vm1, %v641_v14 }
 0x1f3   : > { %v645_v15 = vpop.permute.xlu0 %644 }
 0x1f4   : > { %647 = vst.msk [vmem:[#allocation4] sm:$0xff] %vm591_vm1, %v645_v15 }
 0x1f5 PF: > { %vm653_vm2 = vcmask 31744   ;;  %s2673_s7 = smov 124   ;;  %v2674_v17 = vmov 0.0   ;;  %s2036_s16 = sshll.u32 %s2644_s19, 3  ;;  %vm2675_vm3 = vmmov 0   ;;  %vm701_vm4 = vcmask 130048  }
 0x1f6   : > { %2131 = vmatprep.subr.bf16.mxu0 %v2674_v17  ;;  %2133 = vmatprep.mubr.msk.bf16.mxu0 %vm2675_vm3, %v2674_v17  ;;  %s2676_s26 = smov 120   ;;  %s649_s13 = scalar_lea.vmem [#allocation2], %s2036_s16  ;;  %vm877_vm5 = vcmask 64544   ;;  %vm996_vm6 = vcmask 97344   ;;  %vm1115_vm7 = vcmask 130144   ;;  %vm1234_vm8 = vcmask 162944  }
 0x1f7   : > { %v759_v16 = vld [vmem:[#allocation3] sm:$0xff]  ;;  %v650_v19 = vld [vmem:[%s649_s13] sm:$0xff]  ;;  %2143 = vmatprep.subr.bf16.mxu1 %v2674_v17  ;;  %2145 = vmatprep.mubr.msk.bf16.mxu1 %vm2675_vm3, %v2674_v17  ;;  %s2677_s24 = smov 116   ;;  %s2678_s4 = smov 112   ;;  %vm1353_vm9 = vcmask 195744   ;;  %vm1472_vm10 = vcmask 228544  }
 0x1f8   : > { %764 = vrot.lane.b32.xlu0 %v759_v16, %s2673_s7  ;;  %v658_v18 = vsel %vm653_vm2, %v759_v16, 0  ;;  %883 = vrot.lane.b32.xlu1 %v759_v16, %s2676_s26  ;;  %v651_v20 = vpack.c.bf16 %v650_v19, %v650_v19  ;;  %s2679_s8 = smov 108   ;;  %s2680_s10 = smov 104   ;;  %vm1591_vm11 = vcmask 261344   ;;  %vm1619_vm12 = vcmask 261120  }
 0x1f9   : > { %2132 = vmatpush3.bf16.xpose.msra.mxu0 %v658_v18  ;;  %s2681_s14 = smov 100   ;;  %s2682_s28 = smov 4   ;;  %vm1802_vm13 = vcmask 523264  }
 0x1fa   : > { %2137 = vmatprep.subr.bf16.mxu0 %v2674_v17  ;;  %s2683_s3 = smov 8   ;;  %s2684_s29 = smov 12  }
 0x1fb   : > { %v3083_v48 = vld [vmem:[#allocation4] sm:$0xff]  ;;  %s2685_s11 = smov 16   ;;  %s2687_s16 = smov 24  }
 0x1fc   : > { %761 = vrot.lane.b32.xlu0 %v651_v20, %s2673_s7  ;;  %880 = vrot.lane.b32.xlu1 %v651_v20, %s2676_s26  ;;  %s2689_s13 = smov [#allocation12]  }
 0x200   : > { %2134 = vmatmul.mubr.msk.bf16.vlgmr.msra.gmra.mrb[0].mxu0 %vm653_vm2, %v651_v20  ;;  %1002 = vrot.lane.b32.xlu0 %v759_v16, %s2677_s24 }
 0x201   : > { %2139 = vmatprep.mubr.msk.bf16.mxu0 %vm2675_vm3, %v2674_v17  ;;  %999 = vrot.lane.b32.xlu1 %v651_v20, %s2677_s24 }
 0x202   : > { %2138 = vmatpush3.bf16.msra.mxu0 %v3083_v48 }
 0x203   : > { %2149 = vmatprep.subr.bf16.mxu0 %v2674_v17 }
 0x204   : > { %1121 = vrot.lane.b32.xlu0 %v759_v16, %s2678_s4 }
 0x205   : > { %1118 = vrot.lane.b32.xlu1 %v651_v20, %s2678_s4 }
 0x208   : > { %1240 = vrot.lane.b32.xlu0 %v759_v16, %s2679_s8 }
 0x209   : > { %1237 = vrot.lane.b32.xlu1 %v651_v20, %s2679_s8 }
 0x20c   : > { %1359 = vrot.lane.b32.xlu0 %v759_v16, %s2680_s10 }
 0x20d   : > { %1356 = vrot.lane.b32.xlu1 %v651_v20, %s2680_s10 }
 0x210   : > { %1478 = vrot.lane.b32.xlu0 %v759_v16, %s2681_s14 }
 0x211   : > { %1475 = vrot.lane.b32.xlu1 %v651_v20, %s2681_s14 }
 0x26a   : > { %v765_v21 = vpop.permute.xlu0 %764  ;;  %v884_v23 = vpop.permute.xlu1 %883 }
 0x26b   : > { %v770_v22 = vsel %vm653_vm2, %v765_v21, 0  ;;  %v889_v25 = vsel %vm653_vm2, %v884_v23, 0 }
 0x26c   : > { %2144 = vmatpush3.bf16.xpose.msra.mxu1 %v770_v22 }
 0x26d   : > { %2155 = vmatprep.subr.bf16.mxu1 %v2674_v17 }
 0x26e   : > { %v762_v24 = vpop.permute.xlu0 %761  ;;  %v881_v27 = vpop.permute.xlu1 %880 }
 0x272   : > { %v1003_v26 = vpop.permute.xlu0 %1002 }
 0x273   : > { %2146 = vmatmul.mubr.msk.bf16.vlgmr.msra.gmra.mrb[0].mxu1 %vm653_vm2, %v762_v24  ;;  %v1008_v28 = vsel %vm653_vm2, %v1003_v26, 0  ;;  %v1000_v30 = vpop.permute.xlu1 %999 }
 0x274   : > { %2156 = vmatpush3.bf16.xpose.msra.mxu1 %v889_v25  ;;  %2157 = vmatprep.mubr.msk.bf16.mxu1 %vm2675_vm3, %v2674_v17 }
 0x275   : > { %2167 = vmatprep.subr.bf16.mxu1 %v2674_v17 }
 0x276   : > { %v1122_v29 = vpop.permute.xlu0 %1121 }
 0x277   : > { %v1127_v31 = vsel %vm653_vm2, %v1122_v29, 0  ;;  %v1119_v33 = vpop.permute.xlu1 %1118 }
 0x27a   : > { %v1241_v32 = vpop.permute.xlu0 %1240 }
 0x27b   : > { %2158 = vmatmul.mubr.msk.bf16.vlgmr.msra.gmra.mrb[4].mxu1 %vm653_vm2, %v881_v27  ;;  %v1246_v34 = vsel %vm653_vm2, %v1241_v32, 0  ;;  %v1238_v36 = vpop.permute.xlu1 %1237 }
 0x27c   : > { %2168 = vmatpush3.bf16.xpose.msra.mxu1 %v1008_v28  ;;  %2169 = vmatprep.mubr.msk.bf16.mxu1 %vm2675_vm3, %v2674_v17 }
 0x27d   : > { %2179 = vmatprep.subr.bf16.mxu1 %v2674_v17 }
 0x27e   : > { %v1360_v35 = vpop.permute.xlu0 %1359 }
 0x27f   : > { %v1365_v37 = vsel %vm653_vm2, %v1360_v35, 0  ;;  %v1357_v39 = vpop.permute.xlu1 %1356 }
 0x282   : > { %v1479_v38 = vpop.permute.xlu0 %1478 }
 0x283   : > { %2170 = vmatmul.mubr.msk.bf16.vlgmr.msra.gmra.mrb[8].mxu1 %vm653_vm2, %v1000_v30  ;;  %v1484_v40 = vsel %vm653_vm2, %v1479_v38, 0  ;;  %v1476_v41 = vpop.permute.xlu1 %1475 }
 0x284   : > { %2180 = vmatpush3.bf16.xpose.msra.mxu1 %v1127_v31  ;;  %2181 = vmatprep.mubr.msk.bf16.mxu1 %vm2675_vm3, %v2674_v17 }
 0x285   : > { %2191 = vmatprep.subr.bf16.mxu1 %v2674_v17 }
 0x28b   : > { %2182 = vmatmul.mubr.msk.bf16.vlgmr.msra.gmra.mrb[12].mxu1 %vm653_vm2, %v1119_v33 }
 0x28c   : > { %2192 = vmatpush3.bf16.xpose.msra.mxu1 %v1246_v34  ;;  %2193 = vmatprep.mubr.msk.bf16.mxu1 %vm2675_vm3, %v2674_v17 }
 0x28d   : > { %2203 = vmatprep.subr.bf16.mxu1 %v2674_v17 }
 0x293   : > { %2194 = vmatmul.mubr.msk.bf16.vlgmr.msra.gmra.mrb[16].mxu1 %vm653_vm2, %v1238_v36 }
 0x294   : > { %2204 = vmatpush3.bf16.xpose.msra.mxu1 %v1365_v37  ;;  %2205 = vmatprep.mubr.msk.bf16.mxu1 %vm2675_vm3, %v2674_v17 }
 0x295   : > { %2215 = vmatprep.subr.bf16.mxu1 %v2674_v17 }
 0x29b   : > { %2206 = vmatmul.mubr.msk.bf16.vlgmr.msra.gmra.mrb[20].mxu1 %vm653_vm2, %v1357_v39 }
 0x29c   : > { %2216 = vmatpush3.bf16.xpose.msra.mxu1 %v1484_v40  ;;  %2217 = vmatprep.mubr.msk.bf16.mxu1 %vm2675_vm3, %v2674_v17 }
 0x29d   : > { %2227 = vmatprep.subr.bf16.mxu1 %v2674_v17 }
 0x2a3   : > { %2218 = vmatmul.mubr.msk.bf16.vlgmr.msra.gmra.mrb[24].mxu1 %vm653_vm2, %v1476_v41 }
 0x2a4   : > { %2231 = vmatprep.mubr.msk.bf16.mxu1 %vm2675_vm3, %v2674_v17 }
 0x2d3   : > { %v694_v42 = vpop.f32.mrb[0].mxu0 }
 0x2d4   : > { %v700_v43 = vmul.f32 0.5, %v694_v42  ;;  %v2135_v44 = vpop.f32.mrb[1].mxu0 }
 0x2d5   : > { %v697_v45 = vpop.f32.mrb[2].mxu0 }
 0x2d6   : > { %v702_v46 = vsel %vm701_vm4, %v700_v43, -inf  ;;  %v2136_v47 = vpop.f32.mrb[3].mxu0 }
 0x2d7   : > { %703 = vmax.xlane.f32.xlu0 %v702_v46 }
 0x346   : > { %v806_v49 = vpop.f32.mrb[0].mxu1 }
 0x347   : > { %v812_v50 = vmul.f32 0.5, %v806_v49  ;;  %v2147_v51 = vpop.f32.mrb[1].mxu1 }
 0x348   : > { %v809_v52 = vpop.f32.mrb[2].mxu1 }
 0x349   : > { %v2148_v53 = vpop.f32.mrb[3].mxu1  ;;  %v813_v54 = vsel %vm701_vm4, %v812_v50, -inf }
 0x34a   : > { %814 = vmax.xlane.f32.xlu1 %v813_v54 }
 0x34e   : > { %v925_v55 = vpop.f32.mrb[4].mxu1 }
 0x34f   : > { %v931_v56 = vmul.f32 0.5, %v925_v55  ;;  %v2159_v57 = vpop.f32.mrb[5].mxu1 }
 0x350   : > { %v928_v58 = vpop.f32.mrb[6].mxu1 }
 0x351   : > { %v2160_v59 = vpop.f32.mrb[7].mxu1  ;;  %v932_v60 = vsel %vm701_vm4, %v931_v56, -inf }
 0x352   : > { %933 = vmax.xlane.f32.xlu0 %v932_v60 }
 0x356   : > { %v1044_v61 = vpop.f32.mrb[8].mxu1 }
 0x357   : > { %v1050_v62 = vmul.f32 0.5, %v1044_v61  ;;  %v2171_v63 = vpop.f32.mrb[9].mxu1 }
 0x358   : > { %v1047_v0 = vpop.f32.mrb[10].mxu1 }
 0x359   : > { %v1051_v1 = vsel %vm701_vm4, %v1050_v62, -inf  ;;  %v2172_v2 = vpop.f32.mrb[11].mxu1 }
 0x35a   : > { %1052 = vmax.xlane.f32.xlu0 %v1051_v1 }
 0x35e   : > { %v1163_v3 = vpop.f32.mrb[12].mxu1 }
 0x35f   : > { %v3090_v4 = vmul.f32 0.5, %v1163_v3  ;;  %v2183_v5 = vpop.f32.mrb[13].mxu1 }
 0x360   : > { %v1166_v6 = vpop.f32.mrb[14].mxu1 }
 0x361   : > { %v1170_v7 = vsel %vm701_vm4, %v3090_v4, -inf  ;;  %v2184_v8 = vpop.f32.mrb[15].mxu1 }
 0x362   : > { %1171 = vmax.xlane.f32.xlu1 %v1170_v7 }
 0x364   : > { %v704_v9 = vpop.xlane.xlu0 %703 }
 0x365   : > { %v705_v10 = vsub.f32 %v700_v43, %v704_v9 }
 0x366   : > { %v1282_v11 = vpop.f32.mrb[16].mxu1 }
 0x367   : > { %v706_v12 = vmul.f32 1.442695, %v705_v10  ;;  %v3094_v13 = vmul.f32 0.5, %v1282_v11  ;;  %v2195_v14 = vpop.f32.mrb[17].mxu1 }
 0x368   : > { %v1285_v15 = vpop.f32.mrb[18].mxu1 }
 0x369   : > { %2412 = vpow2.f32 %v706_v12  ;;  %v1289_v16 = vsel %vm701_vm4, %v3094_v13, -inf  ;;  %v2196_v18 = vpop.f32.mrb[19].mxu1 }
 0x36a   : > { %1290 = vmax.xlane.f32.xlu0 %v1289_v16 }
 0x36e   : > { %v1401_v19 = vpop.f32.mrb[20].mxu1 }
 0x36f   : > { %v1407_v20 = vmul.f32 0.5, %v1401_v19  ;;  %v2207_v21 = vpop.f32.mrb[21].mxu1 }
 0x370   : > { %v1404_v22 = vpop.f32.mrb[22].mxu1 }
 0x371   : > { %v1408_v23 = vsel %vm701_vm4, %v1407_v20, -inf  ;;  %v2208_v24 = vpop.f32.mrb[23].mxu1 }
 0x372   : > { %1409 = vmax.xlane.f32.xlu1 %v1408_v23 }
 0x373   : > { %v2413_v25 = vpop.eup %2412 }
 0x374   : > { %v708_v26 = vsel %vm701_vm4, %v2413_v25, 0.0 }
 0x376   : > { %v1520_v27 = vpop.f32.mrb[24].mxu1  ;;  %709 = vadd.xlane.f32.xlu1 %v708_v26 }
 0x377   : > { %v1526_v28 = vmul.f32 0.5, %v1520_v27  ;;  %v2219_v29 = vpop.f32.mrb[25].mxu1 }
 0x378   : > { %v1523_v30 = vpop.f32.mrb[26].mxu1 }
 0x379   : > { %v1527_v31 = vsel %vm701_vm4, %v1526_v28, -inf  ;;  %v2220_v32 = vpop.f32.mrb[27].mxu1 }
 0x37a   : > { %1528 = vmax.xlane.f32.xlu0 %v1527_v31 }
 0x387   : > { %946 = vrot.lane.b32.xlu1 %v3083_v48, %s2676_s26  ;;  %s2688_s26 = smov 28  }
 0x390   : > { %827 = vrot.lane.b32.xlu0 %v3083_v48, %s2673_s7  ;;  %s2686_s7 = smov 20  }
 0x3d7   : > { %v815_v33 = vpop.xlane.xlu1 %814 }
 0x3d8   : > { %v816_v34 = vsub.f32 %v812_v50, %v815_v33 }
 0x3da   : > { %v817_v35 = vmul.f32 1.442695, %v816_v34 }
 0x3dc   : > { %2414 = vpow2.f32 %v817_v35 }
 0x3df   : > { %v934_v36 = vpop.xlane.xlu0 %933 }
 0x3e0   : > { %v935_v37 = vsub.f32 %v931_v56, %v934_v36 }
 0x3e2   : > { %v936_v38 = vmul.f32 1.442695, %v935_v37 }
 0x3e4   : > { %2416 = vpow2.f32 %v936_v38 }
 0x3e6   : > { %v2415_v39 = vpop.eup %2414 }
 0x3e7   : > { %v1053_v40 = vpop.xlane.xlu0 %1052  ;;  %v819_v41 = vsel %vm701_vm4, %v2415_v39, 0.0 }
 0x3e8   : > { %v1054_v42 = vsub.f32 %v1050_v62, %v1053_v40  ;;  %820 = vadd.xlane.f32.xlu0 %v819_v41 }
 0x3ea   : > { %v1055_v43 = vmul.f32 1.442695, %v1054_v42 }
 0x3ec   : > { %2418 = vpow2.f32 %v1055_v43 }
 0x3ee   : > { %v3106_v44 = vpop.eup %2416 }
 0x3ef   : > { %v938_v45 = vsel %vm701_vm4, %v3106_v44, 0.0  ;;  %v1172_v49 = vpop.xlane.xlu1 %1171 }
 0x3f0   : > { %939 = vadd.xlane.f32.xlu1 %v938_v45  ;;  %v1173_v55 = vsub.f32 %v3090_v4, %v1172_v49 }
 0x3f2   : > { %v1174_v59 = vmul.f32 1.442695, %v1173_v55 }
 0x3f6   : > { %v3110_v46 = vpop.eup %2418 }
 0x3f7   : > { %v1057_v47 = vsel %vm701_vm4, %v3110_v46, 0.0  ;;  %v1291_v52 = vpop.xlane.xlu0 %1290 }
 0x3f8   : > { %1058 = vadd.xlane.f32.xlu0 %v1057_v47  ;;  %v1292_v60 = vsub.f32 %v3094_v13, %v1291_v52 }
 0x3fa   : > { %v1293_v62 = vmul.f32 1.442695, %v1292_v60 }
 0x3ff   : > { %v1410_v50 = vpop.xlane.xlu1 %1409 }
 0x400   : > { %v1411_v61 = vsub.f32 %v1407_v20, %v1410_v50 }
 0x401   : > { %1065 = vrot.lane.b32.xlu1 %v3083_v48, %s2677_s24  ;;  %s2538_s24 = sshll.u32 %s2689_s13, 4  ;;  %s2539_s24 = int_to_ptr.vmem [resolvable:$false] %s2538_s24 }
 0x402   : > { %v1412_v0 = vmul.f32 1.442695, %v1411_v61 }
 0x403   : > { %v710_v51 = vpop.xlane.xlu1 %709 }
 0x404   : > { %2420 = vrcp.f32 %v710_v51 }
 0x405   : > { %2422 = vpow2.f32 %v1174_v59 }
 0x406   : > { %2424 = vpow2.f32 %v1293_v62 }
 0x407   : > { %v1529_v53 = vpop.xlane.xlu0 %1528  ;;  %2426 = vpow2.f32 %v1412_v0  ;;  %v947_v11 = vpop.permute.xlu1 %946 }
 0x408   : > { %v1530_v63 = vsub.f32 %v1526_v28, %v1529_v53 }
 0x40a   : > { %v1531_v1 = vmul.f32 1.442695, %v1530_v63 }
 0x40b   : > { %v828_v58 = vpop.permute.xlu0 %827 }
 0x40c   : > { %2428 = vpow2.f32 %v1531_v1 }
 0x40e   : > { %1184 = vrot.lane.b32.xlu0 %v3083_v48, %s2678_s4  ;;  %v2421_v54 = vpop.eup %2420  ;;  %s3360_s4 = sld [smem:[#allocation24_spill]] }
 0x40f   : > { %v712_v56 = vmul.f32 %v2421_v54, %v2413_v25  ;;  %v2423_v2 = vpop.eup %2422 }
 0x410   : > { %v1176_v3 = vsel %vm701_vm4, %v2423_v2, 0.0  ;;  %v2425_v4 = vpop.eup %2424 }
 0x411   : > { %v713_v57 = vpack.c.bf16 %v712_v56, %v712_v56  ;;  %v3125_v5 = vpop.eup %2426  ;;  %v1295_v6 = vsel %vm701_vm4, %v2425_v4, 0.0 }
 0x412   : > { %v1414_v8 = vsel %vm701_vm4, %v3125_v5, 0.0 }
 0x413   : > { %2140 = vmatmul.mubr.msk.bf16.vlgmr.msra.gmra.mrb[4].mxu0 %vm701_vm4, %v713_v57 }
 0x414   : > { %2150 = vmatpush3.bf16.msra.mxu0 %v828_v58  ;;  %2151 = vmatprep.mubr.msk.bf16.mxu0 %vm2675_vm3, %v2674_v17 }
 0x415   : > { %2161 = vmatprep.subr.bf16.mxu0 %v2674_v17 }
 0x416   : > { %v3128_v7 = vpop.eup %2428 }
 0x417   : > { %v1533_v9 = vsel %vm701_vm4, %v3128_v7, 0.0 }
 0x425   : > { %1177 = vadd.xlane.f32.xlu1 %v1176_v3 }
 0x429   : > { %1296 = vadd.xlane.f32.xlu1 %v1295_v6  ;;  %v2405_v6 = vld [vmem:[#allocation9 + $0x8] sm:$0xff]  }
 0x42d   : > { %1415 = vadd.xlane.f32.xlu0 %v1414_v8  ;;  %1534 = vadd.xlane.f32.xlu1 %v1533_v9 }
 0x43e   : > { %1303 = vrot.lane.b32.xlu1 %v3083_v48, %s2679_s8 }
 0x443   : > { %1422 = vrot.lane.b32.xlu0 %v3083_v48, %s2680_s10  ;;  %s3361_s10 = sld [smem:[#allocation27_spill]] }
 0x447   : > { %1541 = vrot.lane.b32.xlu0 %v3083_v48, %s2681_s14  ;;  %s3368_s14 = sld [smem:[#allocation32_spill]] }
 0x475   : > { %v821_v10 = vpop.xlane.xlu0 %820 }
 0x476   : > { %2430 = vrcp.f32 %v821_v10 }
 0x47d   : > { %v940_v12 = vpop.xlane.xlu1 %939 }
 0x47e   : > { %2432 = vrcp.f32 %v940_v12 }
 0x480   : > { %v2431_v13 = vpop.eup %2430 }
 0x481   : > { %v823_v14 = vmul.f32 %v2431_v13, %v2415_v39  ;;  %v1066_v20 = vpop.permute.xlu1 %1065 }
 0x483   : > { %v824_v15 = vpack.c.bf16 %v823_v14, %v823_v14 }
 0x485   : > { %2152 = vmatmul.mubr.msk.bf16.vlgmr.msra.gmra.mrb[8].mxu0 %vm701_vm4, %v824_v15  ;;  %v1059_v16 = vpop.xlane.xlu0 %1058 }
 0x486   : > { %2162 = vmatpush3.bf16.msra.mxu0 %v947_v11  ;;  %2434 = vrcp.f32 %v1059_v16  ;;  %2163 = vmatprep.mubr.msk.bf16.mxu0 %vm2675_vm3, %v2674_v17 }
 0x487   : > { %2173 = vmatprep.subr.bf16.mxu0 %v2674_v17 }
 0x488   : > { %v2433_v18 = vpop.eup %2432 }
 0x489   : > { %v942_v48 = vmul.f32 %v2433_v18, %v3106_v44  ;;  %v1185_v24 = vpop.permute.xlu0 %1184 }
 0x48b   : > { %v943_v19 = vpack.c.bf16 %v942_v48, %v942_v48 }
 0x48d   : > { %2164 = vmatmul.mubr.msk.bf16.vlgmr.msra.gmra.mrb[12].mxu0 %vm701_vm4, %v943_v19 }
 0x48e   : > { %2174 = vmatpush3.bf16.msra.mxu0 %v1066_v20  ;;  %2175 = vmatprep.mubr.msk.bf16.mxu0 %vm2675_vm3, %v2674_v17 }
 0x48f   : > { %2185 = vmatprep.subr.bf16.mxu0 %v2674_v17 }
 0x490   : > { %v2435_v21 = vpop.eup %2434 }
 0x491   : > { %v1061_v22 = vmul.f32 %v2435_v21, %v3110_v46 }
 0x493   : > { %v1062_v23 = vpack.c.bf16 %v1061_v22, %v1061_v22 }
 0x495   : > { %2176 = vmatmul.mubr.msk.bf16.vlgmr.msra.gmra.mrb[16].mxu0 %vm701_vm4, %v1062_v23 }
 0x496   : > { %2186 = vmatpush3.bf16.msra.mxu0 %v1185_v24  ;;  %2187 = vmatprep.mubr.msk.bf16.mxu0 %vm2675_vm3, %v2674_v17  ;;  %v2053_v24 = vld [vmem:[%s3360_s4] ss:$0 sm:$0xff]  ;;  %s3367_s4 = sld [smem:[#allocation31_spill]] }
 0x497   : > { %2197 = vmatprep.subr.bf16.mxu0 %v2674_v17 }
 0x4b2   : > { %v1178_v25 = vpop.xlane.xlu1 %1177 }
 0x4b3   : > { %2436 = vrcp.f32 %v1178_v25 }
 0x4b6   : > { %v1297_v26 = vpop.xlane.xlu1 %1296 }
 0x4b7   : > { %2438 = vrcp.f32 %v1297_v26  ;;  %v1593_v26 = vld [vmem:[%s3003_s25] sm:$0xff] }
 0x4ba   : > { %v1535_v27 = vpop.xlane.xlu1 %1534  ;;  %v1416_v28 = vpop.xlane.xlu0 %1415 }
 0x4bb   : > { %2440 = vrcp.f32 %v1416_v28 }
 0x4bc   : > { %2442 = vrcp.f32 %v1535_v27 }
 0x4bd   : > { %v2437_v29 = vpop.eup %2436 }
 0x4be   : > { %v1180_v30 = vmul.f32 %v2437_v29, %v2423_v2  ;;  %v1304_v31 = vpop.permute.xlu1 %1303  ;;  %v1423_v36 = vpop.permute.xlu0 %1422 }
 0x4c0   : > { %v1181_v32 = vpack.c.bf16 %v1180_v30, %v1180_v30 }
 0x4c1   : > { %v2439_v33 = vpop.eup %2438 }
 0x4c2   : > { %2188 = vmatmul.mubr.msk.bf16.vlgmr.msra.gmra.mrb[20].mxu0 %vm701_vm4, %v1181_v32  ;;  %v1299_v34 = vmul.f32 %v2439_v33, %v2425_v4  ;;  %v1542_v40 = vpop.permute.xlu0 %1541 }
 0x4c3   : > { %2198 = vmatpush3.bf16.msra.mxu0 %v1304_v31  ;;  %2199 = vmatprep.mubr.msk.bf16.mxu0 %vm2675_vm3, %v2674_v17 }
 0x4c4   : > { %2209 = vmatprep.subr.bf16.mxu0 %v2674_v17  ;;  %v1300_v35 = vpack.c.bf16 %v1299_v34, %v1299_v34 }
 0x4c5   : > { %v2441_v37 = vpop.eup %2440 }
 0x4c6   : > { %v1418_v38 = vmul.f32 %v2441_v37, %v3125_v5  ;;  %v2443_v41 = vpop.eup %2442  ;;  %v2404_v5 = vld [vmem:[#allocation9] sm:$0xff]  }
 0x4c7   : > { %v1537_v42 = vmul.f32 %v2443_v41, %v3128_v7  ;;  %2228 = vmatpush3.bf16.msra.mxu1 %v2404_v5  ;;  %v2409_v41 = vld [vmem:[%s3361_s10 + $0x8] sm:$0xff]  }
 0x4c8   : > { %v1419_v39 = vpack.c.bf16 %v1418_v38, %v1418_v38  ;;  %2229 = vmatprep.subr.bf16.mxu1 %v2674_v17  ;;  %v2406_v38 = vld [vmem:[#allocation11] sm:$0xff]  }
 0x4c9   : > { %v1538_v43 = vpack.c.bf16 %v1537_v42, %v1537_v42 }
 0x4ca   : > { %2200 = vmatmul.mubr.msk.bf16.vlgmr.msra.gmra.mrb[24].mxu0 %vm701_vm4, %v1300_v35 }
 0x4cb   : > { %2210 = vmatpush3.bf16.msra.mxu0 %v1423_v36  ;;  %2211 = vmatprep.mubr.msk.bf16.mxu0 %vm2675_vm3, %v2674_v17 }
 0x4cc   : > { %2221 = vmatprep.subr.bf16.mxu0 %v2674_v17  ;;  %2230 = vmatpush3.bf16.msra.mxu1 %v2405_v6 }
 0x4cd   : > { %2243 = vmatprep.subr.bf16.mxu1 %v2674_v17 }
 0x4d2   : > { %2212 = vmatmul.mubr.msk.bf16.vlgmr.msra.gmra.mrb[28].mxu0 %vm701_vm4, %v1419_v39  ;;  %v2407_v39 = vld [vmem:[#allocation11 + $0x8] sm:$0xff]  }
 0x4d3   : > { %2222 = vmatpush3.bf16.msra.mxu0 %v1542_v40  ;;  %2223 = vmatprep.mubr.msk.bf16.mxu0 %vm2675_vm3, %v2674_v17  ;;  %v2408_v40 = vld [vmem:[%s3361_s10] sm:$0xff]  }
 0x4d4   : > { %2235 = vmatprep.subr.bf16.mxu0 %v2674_v17 }
 0x4da   : > { %2224 = vmatmul.mubr.msk.bf16.vlgmr.msra.gmra.mrb[32].mxu0 %vm701_vm4, %v1538_v43 }
 0x4db   : > { %2239 = vmatprep.mubr.msk.bf16.mxu0 %vm2675_vm3, %v2674_v17  ;;  %2236 = vmatpush3.bf16.msra.mxu0 %v2406_v38 }
 0x4dc   : > { %2237 = vmatprep.subr.bf16.mxu0 %v2674_v17 }
 0x4df   : > { %2238 = vmatpush3.bf16.msra.mxu0 %v2407_v39 }
 0x4e6   : > { %v752_v44 = vpop.f32.mrb[4].mxu0 }
 0x4e7   : > { %758 = vst.msk [vmem:[#allocation5] sm:$0xff] %vm653_vm2, %v752_v44  ;;  %v2141_v45 = vpop.f32.mrb[5].mxu0 }
 0x4e8   : > { %v755_v46 = vpop.f32.mrb[6].mxu0 }
 0x4e9   : > { %v2142_v47 = vpop.f32.mrb[7].mxu0 }
 0x558   : > { %v867_v49 = vpop.f32.mrb[8].mxu0 }
 0x559   : > { %874 = vrot.lane.b32.xlu1 %v867_v49, %s2682_s28  ;;  %v2153_v50 = vpop.f32.mrb[9].mxu0  ;;  %s3364_s28 = sld [smem:[#allocation26_spill]] }
 0x55a   : > { %v870_v51 = vpop.f32.mrb[10].mxu0 }
 0x55b   : > { %v2154_v52 = vpop.f32.mrb[11].mxu0 }
 0x560   : > { %v986_v53 = vpop.f32.mrb[12].mxu0 }
 0x561   : > { %993 = vrot.lane.b32.xlu0 %v986_v53, %s2683_s3  ;;  %v2165_v54 = vpop.f32.mrb[13].mxu0  ;;  %v2410_v53 = vld [vmem:[%s3361_s10 + $0x10] sm:$0xff]   ;;  %s1893_s3 = sshll.u32 %s551_s12, 4  ;;  %s3229_s3 = int_to_ptr.vmem [resolvable:$true] %s1893_s3 }
 0x562   : > { %v989_v55 = vpop.f32.mrb[14].mxu0  ;;  %v2411_v54 = vld [vmem:[%s3361_s10 + $0x18] sm:$0xff]   ;;  %p2541_p5 = scmp.lt.s32.totalorder %s3229_s3, %s2539_s24 }
 0x563   : > { %v2166_v56 = vpop.f32.mrb[15].mxu0  ;;  %v2059_v55 = vld [vmem:[%s3364_s28] ss:$0 sm:$0xff] }
 0x568   : > { %v1105_v57 = vpop.f32.mrb[16].mxu0 }
 0x569   : > { %1112 = vrot.lane.b32.xlu1 %v1105_v57, %s2684_s29  ;;  %v2177_v58 = vpop.f32.mrb[17].mxu0 }
 0x56a   : > { %v1108_v59 = vpop.f32.mrb[18].mxu0 }
 0x56b   : > { %v2178_v60 = vpop.f32.mrb[19].mxu0 }
 0x595   : > { %v1224_v61 = vpop.f32.mrb[20].mxu0 }
 0x596   : > { %1231 = vrot.lane.b32.xlu0 %v1224_v61, %s2685_s11  ;;  %v2189_v62 = vpop.f32.mrb[21].mxu0  ;;  %s3362_s11 = sld [smem:[#allocation29_spill]] }
 0x597   : > { %v1227_v63 = vpop.f32.mrb[22].mxu0 }
 0x598   : > { %v2190_v0 = vpop.f32.mrb[23].mxu0 }
 0x59c   : > { %v2057_v46 = vld [vmem:[%s3362_s11] ss:$0 sm:$0xff]  ;;  %s3365_s11 = sld [smem:[#allocation28_spill]] }
 0x59d   : > { %v1343_v1 = vpop.f32.mrb[24].mxu0 }
 0x59e   : > { %1350 = vrot.lane.b32.xlu1 %v1343_v1, %s2686_s7  ;;  %v2201_v2 = vpop.f32.mrb[25].mxu0  ;;  %s2072_s7 = sshll.u32 %s2648_s20, 1  ;;  %s3369_s20 = sld [smem:[#allocation33_spill]] }
 0x59f   : > { %v1346_v3 = vpop.f32.mrb[26].mxu0 }
 0x5a0   : > { %v2202_v4 = vpop.f32.mrb[27].mxu0 }
 0x5a4   : > { %s3370_s21 = smov %s3369_s20 }
 0x5a5   : > { %v1462_v7 = vpop.f32.mrb[28].mxu0 }
 0x5a6   : > { %1469 = vrot.lane.b32.xlu0 %v1462_v7, %s2687_s16  ;;  %v2213_v8 = vpop.f32.mrb[29].mxu0  ;;  %s3366_s16 = sld [smem:[#allocation18_spill]] }
 0x5a7   : > { %v1465_v9 = vpop.f32.mrb[30].mxu0 }
 0x5a8   : > { %v2214_v10 = vpop.f32.mrb[31].mxu0 }
 0x5ac   : > { %p3372_p7 = scmp.ne.s32.totalorder %s3366_s16, 0 }
 0x5ad   : > { %v1581_v11 = vpop.f32.mrb[32].mxu0 }
 0x5ae   : > { %1588 = vrot.lane.b32.xlu1 %v1581_v11, %s2688_s26  ;;  %v2225_v12 = vpop.f32.mrb[33].mxu0  ;;  %s3363_s26 = sld [smem:[#allocation30_spill]] }
 0x5af   : > { %v1584_v13 = vpop.f32.mrb[34].mxu0 }
 0x5b0   : > { %v2226_v14 = vpop.f32.mrb[35].mxu0 }
 0x5b4   : > { %v2058_v49 = vld [vmem:[%s3363_s26] ss:$0 sm:$0xff]  ;;  %s1889_s26 = sadd.s32 %s2644_s19, %s2072_s7  ;;  %s3371_s19 = sand.u32 1, %s2624_s30  }
 0x5b5   : > { %s2073_s28 = sshll.u32 %s1889_s26, 7  ;;  %s1878_s7 = scalar_lea.sflag [#allocation8], %s3371_s19 }
 0x5b6   : > { %s3227_s0 = scalar_lea.hbm %s3369_s20, %s2073_s28  ;;  %s2534_s26 = scalar_lea.vmem %s3229_s3, 128 }
 0x5b7   : > { %p2535_p13 = scmp.ne.s32.totalorder %s3229_s3, %s2534_s26 }
 0x5b9   : > { %p2536_p9 = pnand %p2535_p13, %p3372_p7 }
 0x5bb   : > { %p2537_p11 = pneg %p2536_p9 }
 0x5cb   : > { %v875_v15 = vpop.permute.xlu1 %874 }
 0x5cc   : > { %878 = vst.msk [vmem:[#allocation5] sm:$0xff] %vm877_vm5, %v875_v15  ;;  %v2069_v15 = vld [vmem:[%s3367_s4] ss:$0 sm:$0xff]  ;;  %s2540_s4 = scalar_lea.vmem %s2539_s24, 256 }
 0x5cd   : > { %p2542_p8 = scmp.lt.s32.totalorder %s2540_s4, %s2534_s26 }
 0x5cf   : > { %p2543_p12 = por %p2542_p8, %p2541_p5 }
 0x5d1   : > { %p2544_p2 = pnand %p2543_p12, %p2537_p11 }
 0x5d3   : > { %v994_v16 = vpop.permute.xlu0 %993 }
 0x5d4   : > { %997 = vst.msk [vmem:[#allocation5] sm:$0xff] %vm996_vm6, %v994_v16 }
 0x5db   : > { %v1113_v18 = vpop.permute.xlu1 %1112 }
 0x5dc   : > { %1116 = vst.msk [vmem:[#allocation5] sm:$0xff] %vm1115_vm7, %v1113_v18  ;;  %v2070_v18 = vld [vmem:[%s3368_s14] ss:$0 sm:$0xff] }
 0x608   : > { %v1232_v48 = vpop.permute.xlu0 %1231 }
 0x609   : > { %1235 = vst.msk [vmem:[#allocation5] sm:$0xff] %vm1234_vm8, %v1232_v48 }
 0x610   : > { %v1351_v19 = vpop.permute.xlu1 %1350 }
 0x611   : > { %1354 = vst.msk [vmem:[#allocation5] sm:$0xff] %vm1353_vm9, %v1351_v19 }
 0x618   : > { %v1470_v20 = vpop.permute.xlu0 %1469 }
 0x619   : > { %1473 = vst.msk [vmem:[#allocation5] sm:$0xff] %vm1472_vm10, %v1470_v20 }
 0x620   : > { %v1589_v21 = vpop.permute.xlu1 %1588 }
 0x621   : > { %1592 = vst.msk [vmem:[#allocation5] sm:$0xff] %vm1591_vm11, %v1589_v21 }
 0x628   : > { %v1594_v22 = vld [vmem:[#allocation5] sm:$0xff] }
 0x629   : > { %v1595_v23 = vpack.c.bf16 %v1594_v22, %v1594_v22 }
 0x62b   : > { %2232 = vmatmul.mubr.msk.bf16.vlgmr.msra.gmra.mrb[28].mxu1 %vm1619_vm12, %v1595_v23 }
 0x62c   : > { %2251 = vmatprep.mubr.msk.bf16.mxu1 %vm2675_vm3, %v2674_v17  ;;  %2244 = vmatpush3.bf16.msra.mxu1 %v2408_v40 }
 0x62d   : > { %2245 = vmatprep.subr.bf16.mxu1 %v2674_v17 }
 0x630   : > { %2246 = vmatpush3.bf16.msra.mxu1 %v2409_v41 }
 0x631   : > { %2247 = vmatprep.subr.bf16.mxu1 %v2674_v17 }
 0x634   : > { %2248 = vmatpush3.bf16.msra.mxu1 %v2410_v53 }
 0x635   : > { %2249 = vmatprep.subr.bf16.mxu1 %v2674_v17  ;;  %v2063_v17 = vld [vmem:[%s3365_s11] ss:$0 sm:$0xff] }
 0x638   : > { %2250 = vmatpush3.bf16.msra.mxu1 %v2411_v54 }
 0x6fe   : > { %v1657_v25 = vpop.f32.mrb[28].mxu1 }
 0x6ff   : > { %v1658_v27 = vadd.f32 %v2053_v24, %v1657_v25  ;;  %v2233_v28 = vpop.f32.mrb[29].mxu1 }
 0x700   : > { %v1660_v29 = vpop.f32.mrb[30].mxu1 }
 0x701   : > { %v2234_v30 = vpop.f32.mrb[31].mxu1  ;;  %v1663_v31 = vadd.f32 %v1658_v27, %v1593_v26 }
 0x703   : > { %v1664_v32 = vsel %vm1619_vm12, %v1663_v31, 0.0 }
 0x704   : > { %1665 = vadd.xlane.f32.xlu0 %v1664_v32 }
 0x791   : > { %v1666_v33 = vpop.xlane.xlu0 %1665 }
 0x792   : > { %v1668_v34 = vmul.f32 0.03125, %v1666_v33 }
 0x794   : > { %v1669_v35 = vsub.f32 %v1663_v31, %v1668_v34 }
 0x796   : > { %v1670_v36 = vmul.f32 %v1669_v35, %v1669_v35 }
 0x798   : > { %v1671_v37 = vsel %vm1619_vm12, %v1670_v36, 0.0 }
 0x799   : > { %1672 = vadd.xlane.f32.xlu1 %v1671_v37 }
 0x826   : > { %v1673_v42 = vpop.xlane.xlu1 %1672 }
 0x827   : > { %v1674_v43 = vmul.f32 0.03125, %v1673_v42 }
 0x829   : > { %v1675_v44 = vadd.f32 1e-05, %v1674_v43 }
 0x82b   : > { %2444 = vrsqrt.f32 %v1675_v44 }
 0x835   : > { %v2445_v45 = vpop.eup %2444 }
 0x836   : > { %v1677_v47 = vmul.f32 %v2445_v45, %v1669_v35 }
 0x838   : > { %v1685_v50 = vmul.f32 %v2057_v46, %v1677_v47 }
 0x83a   : > { %v1693_v51 = vadd.f32 %v2058_v49, %v1685_v50 }
 0x83c   : > { %v1694_v52 = vpack.c.bf16 %v1693_v51, %v1693_v51 }
 0x83e   : > { %2240 = vmatmul.mubr.msk.bf16.vlgmr.msra.gmra.mrb[36].mxu0 %vm1619_vm12, %v1694_v52 }
 0x911   : > { %v1755_v56 = vpop.f32.mrb[36].mxu0 }
 0x912   : > { %v1756_v57 = vadd.f32 %v2059_v55, %v1755_v56  ;;  %v2241_v58 = vpop.f32.mrb[37].mxu0 }
 0x913   : > { %v1758_v59 = vpop.f32.mrb[38].mxu0 }
 0x914   : > { %v1761_v60 = vmax.f32 %v1756_v57, 0.0  ;;  %v2242_v61 = vpop.f32.mrb[39].mxu0 }
 0x916   : > { %v1762_v62 = vpack.c.bf16 %v1761_v60, %v1761_v60 }
 0x918   : > { %2252 = vmatmul.mubr.msk.bf16.vlgmr.msra.gmra.mrb[32].mxu1 %vm1802_vm13, %v1762_v62 }
 0x9eb   : > { %v1840_v63 = vpop.f32.mrb[32].mxu1 }
 0x9ec   : > { %v1841_v0 = vadd.f32 %v2063_v17, %v1840_v63  ;;  %v2253_v1 = vpop.f32.mrb[33].mxu1 }
 0x9ed   : > { %v1843_v2 = vpop.f32.mrb[34].mxu1 }
 0x9ee   : > { %v2254_v3 = vpop.f32.mrb[35].mxu1  ;;  %v1846_v4 = vadd.f32 %v1841_v0, %v1693_v51 }
 0x9f0   : > { %v1847_v5 = vsel %vm1619_vm12, %v1846_v4, 0.0 }
 0x9f1   : > { %1848 = vadd.xlane.f32.xlu0 %v1847_v5 }
 0xa7e   : > { %v1849_v6 = vpop.xlane.xlu0 %1848 }
 0xa7f   : > { %v1850_v7 = vmul.f32 0.03125, %v1849_v6 }
 0xa81   : > { %v1851_v8 = vsub.f32 %v1846_v4, %v1850_v7 }
 0xa83   : > { %v1852_v9 = vmul.f32 %v1851_v8, %v1851_v8 }
 0xa85   : > { %v1853_v10 = vsel %vm1619_vm12, %v1852_v9, 0.0 }
 0xa86   : > { %1854 = vadd.xlane.f32.xlu0 %v1853_v10 }
 0xb13   : > { %v1855_v11 = vpop.xlane.xlu0 %1854 }
 0xb14   : > { %v1856_v12 = vmul.f32 0.03125, %v1855_v11 }
 0xb16   : > { %v1857_v13 = vadd.f32 1e-05, %v1856_v12 }
 0xb18   : > { %2446 = vrsqrt.f32 %v1857_v13 }
 0xb22   : > { %v2447_v14 = vpop.eup %2446 }
 0xb23   : > { %v1859_v16 = vmul.f32 %v2447_v14, %v1851_v8 }
 0xb25   : > { %v1867_v48 = vmul.f32 %v2069_v15, %v1859_v16 }
 0xb27   : > { %v1875_v19 = vadd.f32 %v2070_v18, %v1867_v48 }
 0xb29   : > { %1876 = vst.msk [vmem:[%s551_s12] sm:$0xff] %vm1619_vm12, %v1875_v19 }
 0xb2a   : > { %2547 = shalt.err (!%p2544_p2)
}
 0xb2b   : > { %s2548_s27 = scalar_lea.hbm %s3227_s0, 128  ;;  %s2552_s8 = scalar_lea.hbm %s3370_s21, 512 }
 0xb2c   : > { %p2549_p6 = scmp.ne.s32.totalorder %s3227_s0, %s2548_s27  ;;  %p2553_p4 = scmp.lt.u32.totalorder %s3227_s0, %s3370_s21 }
 0xb2d   : > { %p2554_p1 = scmp.lt.u32.totalorder %s2552_s8, %s2548_s27  ;;  %p2556_p13 = scmp.lt.u32.totalorder %s2548_s27, %s3227_s0 }
 0xb2e   : > { %p2550_p10 = pnand %p2549_p6, %p3372_p7 }
 0xb2f   : > { %p2555_p3 = por %p2554_p1, %p2553_p4 }
 0xb30   : > { %p2551_p0 = pneg %p2550_p10 }
 0xb31   : > { %p2557_p9 = por %p2556_p13, %p2555_p3 }
 0xb33   : > { %p2558_p11 = pnand %p2557_p9, %p2551_p0 }
 0xb35   : > { %2561 = shalt.err (!%p2558_p11)
}
 0xb36   : > { %2265 = dma.vmem_to_hbm [thread:$0]  (%p3372_p7), %s3229_s3, 128, %s3227_s0, %s1878_s7  }
 0xb37 PF: > { %s3373_s29 = sld [smem:[#allocation16_spill]]  ;;  %s3374_s11 = sld [smem:[#allocation19_spill]] }
 0xb38   : > { %p2287_p5 = scmp.ge.s32.totalorder %s2660_s23, 2 }
 0xb3d   : > { %s1905_s20 = sand.u32 1, %s3373_s29   ;;  %p3375_p8 = scmp.ne.s32.totalorder %s3374_s11, 0 }
 0xb3e   : > { %s1906_s19 = scalar_lea.sflag [#allocation8], %s1905_s20 }
 0xb3f   : > { %p2279_p12 = pnand %p2287_p5, %p3375_p8 }
 0xb41   : > { %2615 = dma.done.wait (!%p2279_p12), %s1906_s19, 128  }
 0xb42   : > { %2617 = vsyncadd (!%p2279_p12), %s1906_s19, 4294967168  ;;  %s31_s23 = sadd.s32 1, %s2660_s23   ;;  %s3376_s19 = sld [smem:[#allocation17_spill]] }
 0xb43   : > { %p28_p2 = scmp.ge.s32.totalorder %s31_s23, 6   ;;  %s3377_s0 = sld [smem:[#allocation20_spill]] }
 0xb44   : > { %s3378_s29 = smov %s2624_s30  ;;  %s3379_s30 = smov %s2628_s15 }
 0xb45   : > { %s3380_s15 = smov %s2940_s6  ;;  %s3381_s16 = smov %s2636_s17 }
 0xb46   : > { %s3382_s17 = smov %s2640_s18  ;;  %s3383_s18 = smov %s2935_s5 }
 0xb47   : > { %s3384_s20 = smov %s2656_s22  ;;  %s3386_s22 = smov %s3392_s9 }
 0xb48   :  { %30 = sbr.rel (!%p28_p2) target bundleno = 24 (0x18), region = 137 }
 0xb49   : > { %3385 = sst [smem:[#allocation16_spill]] %s3377_s0 }
 0xb4f   :  { %1911 = vsyncpa [#allocation7], 1 }
 0xb50   :  { %1913 = vsyncpa [#allocation7 + $0x1], 1 }
 0xb51   :  { %1914 = vsyncpa [#allocation10], 1 }
 0xb52   :  { %1915 = vsyncpa [#allocation8], 1 }
 0xb53   :  { %1917 = vsyncpa [#allocation8 + $0x1], 1 }

</bundles_post_ra>
